<compile_context>
chip_gen: v6e
topology: v6e:2x2x1
jax: 0.10.0
libtpu: 0.0.40
codegen_flags: <defaults>
</compile_context>

<pallas_src>
import jax
import jax.numpy as jnp
from jax.experimental import pallas as pl
from jax.experimental.pallas import tpu as pltpu


# ----------------------------- Pallas kernel --------------------------------
def neat_wpe_kernel(idx_ref, uidx_ref, wcomb_ref, ucred_ref,
                    whht_ref, b_ref, fcwt_ref,
                    out_ref, scred_ref, xproj_scr):
    # idx_ref  : (T*B, 1) int32   word indices, time-major (row r = t*B + b)
    # uidx_ref : (B, 1)   int32   user indices
    # wcomb_ref: (V, 4H)  float32 word_embeddings @ W_ih^T (pre-folded)
    # ucred_ref: (1, U)   float32 user-credibility table (row layout)
    # whht_ref : (H, 4H)  float32 W_hh^T (pre-transposed)
    # b_ref    : (1, 4H)  float32 b_ih + b_hh
    # fcwt_ref : (H, C)   float32 fc weight, pre-transposed (no bias)
    # out_ref  : (1, C)   float32
    # scred_ref: (B, 1)   float32 exp(credibility)
    # xproj_scr: (T*B, 4H) float32 VMEM scratch for the hoisted input proj.
    TB = idx_ref.shape[0]
    V = wcomb_ref.shape[0]
    U = ucred_ref.shape[1]
    B = uidx_ref.shape[0]
    H = whht_ref.shape[0]
    T = TB // B
    f32 = jnp.float32

    # ---- user credibility: one-hot select on VPU + lane reduce + exp -------
    uidx = uidx_ref[...]                                               # (B, 1)
    u_onehot = (uidx == jax.lax.broadcasted_iota(jnp.int32, (B, U), 1)).astype(f32)
    creds = jnp.exp(jnp.sum(u_onehot * ucred_ref[...],
                            axis=1, keepdims=True))                   # (B, 1)
    scred_ref[...] = creds

    # ---- fused gather + input projection: one MXU matmul + fused bias ------
    # x_proj[r] = word_embeddings[idx[r]] @ W_ih^T + (b_ih + b_hh)
    idx = idx_ref[...]                                                 # (T*B, 1)
    onehot = (idx == jax.lax.broadcasted_iota(jnp.int32, (TB, V), 1)).astype(f32)
    xproj_scr[...] = jnp.dot(onehot, wcomb_ref[...],
                             preferred_element_type=f32) + b_ref[...]  # (T*B, 4H)

    whh_t = whht_ref[...]                                              # (H, 4H)

    # ---- LSTM recurrence (PyTorch gate order i, f, g, o), fully unrolled ---
    h = jnp.zeros((B, H), f32)
    c = jnp.zeros((B, H), f32)
    for t in range(T):
        gates = xproj_scr[t * B:(t + 1) * B, :] + jnp.dot(
            h, whh_t, preferred_element_type=f32)                      # (B, 4H)
        sg = jax.nn.sigmoid(gates)           # full-width EUP push: i, f, o
        tg = jnp.tanh(gates[:, 2 * H:3 * H])  # EUP push on g slice only
        i_g = sg[:, 0 * H:1 * H]
        f_g = sg[:, 1 * H:2 * H]
        o_g = sg[:, 3 * H:4 * H]
        c = f_g * c + i_g * tg
        h = o_g * jnp.tanh(c)

    # Dropout(h_n) is identity at inference time.
    # cred^T @ post_feature == sum_b cred_b * h_b
    thread = jnp.tanh(jnp.sum(creds * h, axis=0, keepdims=True))       # (1, H)
    out_ref[...] = jnp.dot(thread, fcwt_ref[...],
                           preferred_element_type=f32)                 # (1, C)


# ------------------------------- wrappers ------------------------------------
def neat_wpe_forward_batched(x_post_word_idxs, x_user_idxs, params):
    """Batched entry point: N threads per pallas_call, one grid step each.

    x_post_word_idxs: (N, B, T) int, x_user_idxs: (N, B) int.
    Returns final_out (N, C), scaled_creds (N, B, 1).
    """
    word_emb = params["word_embeddings"]              # (V, E)
    user_cred = params["user_credibility"]            # (U, 1)
    w_ih = params["w_ih"]                             # (4H, E)
    w_hh = params["w_hh"]                             # (4H, H)
    fc_w = params["fc_w"]                             # (C, H)

    N, B, T = x_post_word_idxs.shape
    V = word_emb.shape[0]
    U = user_cred.shape[0]
    H = w_hh.shape[1]
    H4 = 4 * H
    C = fc_w.shape[0]

    # ---- constant weight prep (tiny, outside the kernel) --------------------
    hp = jax.lax.Precision.HIGHEST
    w_comb = jnp.dot(word_emb, w_ih.T, precision=hp)          # (V, 4H) folded
    whh_t = jnp.transpose(w_hh)                               # (H, 4H)
    fcw_t = jnp.transpose(fc_w)                               # (H, C)
    bias = (params["b_ih"] + params["b_hh"])[None, :]         # (1, 4H)
    ucred_row = jnp.reshape(user_cred, (1, U))                # (1, U)

    # ---- byte-sized index prep (time-major per thread) ----------------------
    idx_tm = jnp.transpose(x_post_word_idxs, (0, 2, 1)).reshape(
        N, T * B, 1).astype(jnp.int32)
    uidx = x_user_idxs.reshape(N, B, 1).astype(jnp.int32)

    final_out, scaled_creds = pl.pallas_call(
        neat_wpe_kernel,
        out_shape=(jax.ShapeDtypeStruct((N, 1, C), jnp.float32),
                   jax.ShapeDtypeStruct((N, B, 1), jnp.float32)),
        grid=(N,),
        in_specs=[
            pl.BlockSpec((None, T * B, 1), lambda n: (n, 0, 0)),   # idx
            pl.BlockSpec((None, B, 1), lambda n: (n, 0, 0)),       # uidx
            pl.BlockSpec((V, H4), lambda n: (0, 0)),               # W_comb
            pl.BlockSpec((1, U), lambda n: (0, 0)),                # user cred
            pl.BlockSpec((H, H4), lambda n: (0, 0)),               # W_hh^T
            pl.BlockSpec((1, H4), lambda n: (0, 0)),               # bias
            pl.BlockSpec((H, C), lambda n: (0, 0)),                # fc_w^T
        ],
        out_specs=(
            pl.BlockSpec((None, 1, C), lambda n: (n, 0, 0)),
            pl.BlockSpec((None, B, 1), lambda n: (n, 0, 0)),
        ),
        scratch_shapes=[pltpu.VMEM((T * B, H4), jnp.float32)],
        compiler_params=pltpu.CompilerParams(
            dimension_semantics=("parallel",)),
    )(idx_tm, uidx, w_comb, ucred_row, whh_t, bias, fcw_t)

    return final_out[:, 0, :], scaled_creds            # (N, C), (N, B, 1)


def neat_wpe_forward(x_post_word_idxs, x_user_idxs, x_user_clusters, params):
    """Module-semantics entry point (single thread), matching NeatWPE.forward."""
    # x_user_clusters is unused by the reference forward pass.
    del x_user_clusters
    out, creds = neat_wpe_forward_batched(
        x_post_word_idxs[None], x_user_idxs[None], params)
    return out[0], creds[0]                             # (C,), (B, 1)


# --------------------------- pure-JAX reference -------------------------------
def neat_wpe_reference(x_post_word_idxs, x_user_idxs, params):
    word_emb = params["word_embeddings"]
    user_cred = params["user_credibility"]
    w_ih, w_hh = params["w_ih"], params["w_hh"]
    b_ih, b_hh = params["b_ih"], params["b_hh"]
    fc_w = params["fc_w"]
    H = w_hh.shape[1]

    emb = word_emb[x_post_word_idxs]                  # (B, T, E)
    creds = jnp.exp(user_cred[x_user_idxs])           # (B, 1)
    B = emb.shape[0]

    def cell(carry, x_t):
        h, c = carry
        gates = x_t @ w_ih.T + h @ w_hh.T + b_ih + b_hh
        i = jax.nn.sigmoid(gates[:, 0 * H:1 * H])
        f = jax.nn.sigmoid(gates[:, 1 * H:2 * H])
        g = jnp.tanh(gates[:, 2 * H:3 * H])
        o = jax.nn.sigmoid(gates[:, 3 * H:4 * H])
        c = f * c + i * g
        h = o * jnp.tanh(c)
        return (h, c), None

    (h_n, _), _ = jax.lax.scan(
        cell, (jnp.zeros((B, H)), jnp.zeros((B, H))),
        jnp.transpose(emb, (1, 0, 2)))
    thread = jnp.tanh(creds.T @ h_n)                  # (1, H)
    out = thread @ fc_w.T                             # (1, C)
    return out[0], creds


# --------------------------------- main ---------------------------------------
if __name__ == "__main__":
    # config
    V, U, C = 64, 10, 4          # vocab_size, user_size, num_classes
    E, H = 32, 32                # embed_size, hidden_size
    B, T = 8, 16                 # posts per thread, tokens per post
    N = 4                        # threads batched per pallas_call (grid axis)

    key = jax.random.PRNGKey(0)
    keys = jax.random.split(key, 9)

    params = {
        "word_embeddings": jax.random.normal(keys[0], (V, E), jnp.float32) * 0.5,
        "user_credibility": jax.random.normal(keys[1], (U, 1), jnp.float32) * 0.1,
        "w_ih": jax.random.normal(keys[2], (4 * H, E), jnp.float32) * 0.1,
        "w_hh": jax.random.normal(keys[3], (4 * H, H), jnp.float32) * 0.1,
        "b_ih": jax.random.normal(keys[4], (4 * H,), jnp.float32) * 0.1,
        "b_hh": jax.random.normal(keys[5], (4 * H,), jnp.float32) * 0.1,
        "fc_w": jax.random.normal(keys[6], (C, H), jnp.float32) * 0.1,
    }

    x_post_word_idxs = jax.random.randint(keys[7], (N, B, T), 0, V, jnp.int32)
    x_user_idxs = jax.random.randint(keys[8], (N, B), 0, U, jnp.int32)
    x_user_clusters = jnp.zeros((N, B), jnp.int32)   # unused by forward()

    # Batched kernel (grid over threads, "parallel" axis for v7x megacore).
    fwd_batched = jax.jit(neat_wpe_forward_batched)
    outs, creds = fwd_batched(x_post_word_idxs, x_user_idxs, params)
    jax.block_until_ready((outs, creds))

    # Module-semantics single-thread wrapper.
    fwd_single = jax.jit(neat_wpe_forward)
    out0, cred0 = fwd_single(
        x_post_word_idxs[0], x_user_idxs[0], x_user_clusters[0], params)
    jax.block_until_ready((out0, cred0))

    assert outs.shape == (N, C) and creds.shape == (N, B, 1)
    assert out0.shape == (C,) and cred0.shape == (B, 1)

    for n in range(N):
        ref_out, ref_creds = neat_wpe_reference(
            x_post_word_idxs[n], x_user_idxs[n], params)
        assert jnp.allclose(outs[n], ref_out, atol=1e-5, rtol=1e-5)
        assert jnp.allclose(creds[n], ref_creds, atol=1e-5, rtol=1e-5)

    assert jnp.allclose(out0, outs[0], atol=1e-5, rtol=1e-5)
    assert jnp.allclose(cred0, creds[0], atol=1e-5, rtol=1e-5)

    print("KERNEL_OK")
</pallas_src>

<mosaic_0001>
module attributes {stable_mosaic.version = 11 : i64} {
  func.func @neat_wpe_kernel(%arg0: i32, %arg1: memref<1x128x1xi32, #tpu.memory_space<vmem>>, %arg2: memref<1x8x1xi32, #tpu.memory_space<vmem>>, %arg3: memref<64x128xf32, #tpu.memory_space<vmem>>, %arg4: memref<1x10xf32, #tpu.memory_space<vmem>>, %arg5: memref<32x128xf32, #tpu.memory_space<vmem>>, %arg6: memref<1x128xf32, #tpu.memory_space<vmem>>, %arg7: memref<32x4xf32, #tpu.memory_space<vmem>>, %arg8: memref<1x1x4xf32, #tpu.memory_space<vmem>>, %arg9: memref<1x8x1xf32, #tpu.memory_space<vmem>>, %arg10: memref<128x128xf32, #tpu.memory_space<vmem>>) attributes {dimension_semantics = [#tpu.dimension_semantics<parallel>], iteration_bounds = array<i64: 4>, scalar_prefetch = 0 : i64, scratch_operands = 1 : i64, tpu.core_type = #tpu.core_type<tc>, window_params = [{transform_indices = @transform_0, window_bounds = array<i64: 1, 128, 1>}, {transform_indices = @transform_1, window_bounds = array<i64: 1, 8, 1>}, {pipeline_mode = #tpu.pipeline_mode<synchronous>, transform_indices = @transform_2, window_bounds = array<i64: 64, 128>}, {pipeline_mode = #tpu.pipeline_mode<synchronous>, transform_indices = @transform_3, window_bounds = array<i64: 1, 10>}, {pipeline_mode = #tpu.pipeline_mode<synchronous>, transform_indices = @transform_4, window_bounds = array<i64: 32, 128>}, {pipeline_mode = #tpu.pipeline_mode<synchronous>, transform_indices = @transform_5, window_bounds = array<i64: 1, 128>}, {pipeline_mode = #tpu.pipeline_mode<synchronous>, transform_indices = @transform_6, window_bounds = array<i64: 32, 4>}, {transform_indices = @transform_7, window_bounds = array<i64: 1, 1, 4>}, {transform_indices = @transform_8, window_bounds = array<i64: 1, 8, 1>}]} {
    %c0 = arith.constant 0 : index
    %c0_0 = arith.constant 0 : index
    %c0_1 = arith.constant 0 : index
    %0 = vector.load %arg2[%c0, %c0_0, %c0_1] : memref<1x8x1xi32, #tpu.memory_space<vmem>>, vector<1x8x1xi32>
    %1 = vector.shape_cast %0 : vector<1x8x1xi32> to vector<8x1xi32>
    %2 = tpu.iota {dimensions = array<i32: 1>} : vector<8x10xi32>
    %3 = vector.broadcast %1 : vector<8x1xi32> to vector<8x10xi32>
    %4 = arith.cmpi eq, %3, %2 : vector<8x10xi32>
    %5 = arith.extui %4 : vector<8x10xi1> to vector<8x10xi32>
    %6 = arith.sitofp %5 : vector<8x10xi32> to vector<8x10xf32>
    %c0_2 = arith.constant 0 : index
    %c0_3 = arith.constant 0 : index
    %7 = vector.load %arg4[%c0_2, %c0_3] : memref<1x10xf32, #tpu.memory_space<vmem>>, vector<1x10xf32>
    %8 = vector.broadcast %7 : vector<1x10xf32> to vector<8x10xf32>
    %9 = arith.mulf %6, %8 : vector<8x10xf32>
    %cst = arith.constant dense<0.000000e+00> : vector<8xf32>
    %10 = vector.multi_reduction <add>, %9, %cst [1] : vector<8x10xf32> to vector<8xf32>
    %11 = vector.shape_cast %10 : vector<8xf32> to vector<8x1xf32>
    %12 = math.exp %11 : vector<8x1xf32>
    %c0_4 = arith.constant 0 : index
    %c0_5 = arith.constant 0 : index
    %c0_6 = arith.constant 0 : index
    %13 = vector.load %arg9[%c0_4, %c0_5, %c0_6] : memref<1x8x1xf32, #tpu.memory_space<vmem>>, vector<1x8x1xf32>
    %14 = vector.shape_cast %13 : vector<1x8x1xf32> to vector<8x1xf32>
    %15 = vector.shape_cast %12 : vector<8x1xf32> to vector<1x8x1xf32>
    tpu.vector_store %arg9[%c0_4, %c0_5, %c0_6], %15 {strides = array<i32>} : memref<1x8x1xf32, #tpu.memory_space<vmem>>, vector<1x8x1xf32>,
    %c0_7 = arith.constant 0 : index
    %c0_8 = arith.constant 0 : index
    %c0_9 = arith.constant 0 : index
    %16 = vector.load %arg1[%c0_7, %c0_8, %c0_9] : memref<1x128x1xi32, #tpu.memory_space<vmem>>, vector<1x128x1xi32>
    %17 = vector.shape_cast %16 : vector<1x128x1xi32> to vector<128x1xi32>
    %18 = tpu.iota {dimensions = array<i32: 1>} : vector<128x64xi32>
    %19 = vector.broadcast %17 : vector<128x1xi32> to vector<128x64xi32>
    %20 = arith.cmpi eq, %19, %18 : vector<128x64xi32>
    %21 = arith.extui %20 : vector<128x64xi1> to vector<128x64xi32>
    %22 = arith.sitofp %21 : vector<128x64xi32> to vector<128x64xf32>
    %c0_10 = arith.constant 0 : index
    %c0_11 = arith.constant 0 : index
    %23 = vector.load %arg3[%c0_10, %c0_11] : memref<64x128xf32, #tpu.memory_space<vmem>>, vector<64x128xf32>
    %cst_12 = arith.constant dense<0.000000e+00> : vector<128x128xf32>
    %24 = tpu.matmul %22, %23, %cst_12 {dimension_numbers = #tpu.dot_dimension_numbers<[1], [0], [0], [1], [0, 0, 1, 1], [], []>} : vector<128x64xf32>, vector<64x128xf32>, vector<128x128xf32> -> vector<128x128xf32>
    %c0_13 = arith.constant 0 : index
    %c0_14 = arith.constant 0 : index
    %25 = vector.load %arg6[%c0_13, %c0_14] : memref<1x128xf32, #tpu.memory_space<vmem>>, vector<1x128xf32>
    %26 = vector.broadcast %25 : vector<1x128xf32> to vector<128x128xf32>
    %27 = arith.addf %24, %26 : vector<128x128xf32>
    %c0_15 = arith.constant 0 : index
    %c0_16 = arith.constant 0 : index
    %28 = vector.load %arg10[%c0_15, %c0_16] : memref<128x128xf32, #tpu.memory_space<vmem>>, vector<128x128xf32>
    tpu.vector_store %arg10[%c0_15, %c0_16], %27 {strides = array<i32>} : memref<128x128xf32, #tpu.memory_space<vmem>>, vector<128x128xf32>,
    %c0_17 = arith.constant 0 : index
    %c0_18 = arith.constant 0 : index
    %29 = vector.load %arg5[%c0_17, %c0_18] : memref<32x128xf32, #tpu.memory_space<vmem>>, vector<32x128xf32>
    %cst_19 = arith.constant 0.000000e+00 : f32
    %30 = vector.broadcast %cst_19 : f32 to vector<8x32xf32>
    %cst_20 = arith.constant 0.000000e+00 : f32
    %31 = vector.broadcast %cst_20 : f32 to vector<8x32xf32>
    %c0_21 = arith.constant 0 : index
    %c0_22 = arith.constant 0 : index
    %32 = vector.load %arg10[%c0_21, %c0_22] : memref<128x128xf32, #tpu.memory_space<vmem>>, vector<8x128xf32>
    %cst_23 = arith.constant dense<0.000000e+00> : vector<8x128xf32>
    %33 = tpu.matmul %30, %29, %cst_23 {dimension_numbers = #tpu.dot_dimension_numbers<[1], [0], [0], [1], [0, 0, 1, 1], [], []>} : vector<8x32xf32>, vector<32x128xf32>, vector<8x128xf32> -> vector<8x128xf32>
    %34 = arith.addf %32, %33 : vector<8x128xf32>
    %35 = arith.negf %34 : vector<8x128xf32>
    %36 = math.exp %35 : vector<8x128xf32>
    %cst_24 = arith.constant 1.000000e+00 : f32
    %37 = vector.broadcast %cst_24 : f32 to vector<8x128xf32>
    %38 = arith.addf %37, %36 : vector<8x128xf32>
    %39 = arith.divf %37, %38 : vector<8x128xf32>
    %40 = vector.extract_strided_slice %34 {offsets = [0, 64], sizes = [8, 32], strides = [1, 1]} : vector<8x128xf32> to vector<8x32xf32>
    %41 = math.tanh %40 : vector<8x32xf32>
    %42 = vector.extract_strided_slice %39 {offsets = [0, 0], sizes = [8, 32], strides = [1, 1]} : vector<8x128xf32> to vector<8x32xf32>
    %43 = vector.extract_strided_slice %39 {offsets = [0, 32], sizes = [8, 32], strides = [1, 1]} : vector<8x128xf32> to vector<8x32xf32>
    %44 = vector.extract_strided_slice %39 {offsets = [0, 96], sizes = [8, 32], strides = [1, 1]} : vector<8x128xf32> to vector<8x32xf32>
    %45 = arith.mulf %43, %31 : vector<8x32xf32>
    %46 = arith.mulf %42, %41 : vector<8x32xf32>
    %47 = arith.addf %45, %46 : vector<8x32xf32>
    %48 = math.tanh %47 : vector<8x32xf32>
    %49 = arith.mulf %44, %48 : vector<8x32xf32>
    %c8 = arith.constant 8 : index
    %c0_25 = arith.constant 0 : index
    %50 = vector.load %arg10[%c8, %c0_25] : memref<128x128xf32, #tpu.memory_space<vmem>>, vector<8x128xf32>
    %cst_26 = arith.constant dense<0.000000e+00> : vector<8x128xf32>
    %51 = tpu.matmul %49, %29, %cst_26 {dimension_numbers = #tpu.dot_dimension_numbers<[1], [0], [0], [1], [0, 0, 1, 1], [], []>} : vector<8x32xf32>, vector<32x128xf32>, vector<8x128xf32> -> vector<8x128xf32>
    %52 = arith.addf %50, %51 : vector<8x128xf32>
    %53 = arith.negf %52 : vector<8x128xf32>
    %54 = math.exp %53 : vector<8x128xf32>
    %cst_27 = arith.constant 1.000000e+00 : f32
    %55 = vector.broadcast %cst_27 : f32 to vector<8x128xf32>
    %56 = arith.addf %55, %54 : vector<8x128xf32>
    %57 = arith.divf %55, %56 : vector<8x128xf32>
    %58 = vector.extract_strided_slice %52 {offsets = [0, 64], sizes = [8, 32], strides = [1, 1]} : vector<8x128xf32> to vector<8x32xf32>
    %59 = math.tanh %58 : vector<8x32xf32>
    %60 = vector.extract_strided_slice %57 {offsets = [0, 0], sizes = [8, 32], strides = [1, 1]} : vector<8x128xf32> to vector<8x32xf32>
    %61 = vector.extract_strided_slice %57 {offsets = [0, 32], sizes = [8, 32], strides = [1, 1]} : vector<8x128xf32> to vector<8x32xf32>
    %62 = vector.extract_strided_slice %57 {offsets = [0, 96], sizes = [8, 32], strides = [1, 1]} : vector<8x128xf32> to vector<8x32xf32>
    %63 = arith.mulf %61, %47 : vector<8x32xf32>
    %64 = arith.mulf %60, %59 : vector<8x32xf32>
    %65 = arith.addf %63, %64 : vector<8x32xf32>
    %66 = math.tanh %65 : vector<8x32xf32>
    %67 = arith.mulf %62, %66 : vector<8x32xf32>
    %c16 = arith.constant 16 : index
    %c0_28 = arith.constant 0 : index
    %68 = vector.load %arg10[%c16, %c0_28] : memref<128x128xf32, #tpu.memory_space<vmem>>, vector<8x128xf32>
    %cst_29 = arith.constant dense<0.000000e+00> : vector<8x128xf32>
    %69 = tpu.matmul %67, %29, %cst_29 {dimension_numbers = #tpu.dot_dimension_numbers<[1], [0], [0], [1], [0, 0, 1, 1], [], []>} : vector<8x32xf32>, vector<32x128xf32>, vector<8x128xf32> -> vector<8x128xf32>
    %70 = arith.addf %68, %69 : vector<8x128xf32>
    %71 = arith.negf %70 : vector<8x128xf32>
    %72 = math.exp %71 : vector<8x128xf32>
    %cst_30 = arith.constant 1.000000e+00 : f32
    %73 = vector.broadcast %cst_30 : f32 to vector<8x128xf32>
    %74 = arith.addf %73, %72 : vector<8x128xf32>
    %75 = arith.divf %73, %74 : vector<8x128xf32>
    %76 = vector.extract_strided_slice %70 {offsets = [0, 64], sizes = [8, 32], strides = [1, 1]} : vector<8x128xf32> to vector<8x32xf32>
    %77 = math.tanh %76 : vector<8x32xf32>
    %78 = vector.extract_strided_slice %75 {offsets = [0, 0], sizes = [8, 32], strides = [1, 1]} : vector<8x128xf32> to vector<8x32xf32>
    %79 = vector.extract_strided_slice %75 {offsets = [0, 32], sizes = [8, 32], strides = [1, 1]} : vector<8x128xf32> to vector<8x32xf32>
    %80 = vector.extract_strided_slice %75 {offsets = [0, 96], sizes = [8, 32], strides = [1, 1]} : vector<8x128xf32> to vector<8x32xf32>
    %81 = arith.mulf %79, %65 : vector<8x32xf32>
    %82 = arith.mulf %78, %77 : vector<8x32xf32>
    %83 = arith.addf %81, %82 : vector<8x32xf32>
    %84 = math.tanh %83 : vector<8x32xf32>
    %85 = arith.mulf %80, %84 : vector<8x32xf32>
    %c24 = arith.constant 24 : index
    %c0_31 = arith.constant 0 : index
    %86 = vector.load %arg10[%c24, %c0_31] : memref<128x128xf32, #tpu.memory_space<vmem>>, vector<8x128xf32>
    %cst_32 = arith.constant dense<0.000000e+00> : vector<8x128xf32>
    %87 = tpu.matmul %85, %29, %cst_32 {dimension_numbers = #tpu.dot_dimension_numbers<[1], [0], [0], [1], [0, 0, 1, 1], [], []>} : vector<8x32xf32>, vector<32x128xf32>, vector<8x128xf32> -> vector<8x128xf32>
    %88 = arith.addf %86, %87 : vector<8x128xf32>
    %89 = arith.negf %88 : vector<8x128xf32>
    %90 = math.exp %89 : vector<8x128xf32>
    %cst_33 = arith.constant 1.000000e+00 : f32
    %91 = vector.broadcast %cst_33 : f32 to vector<8x128xf32>
    %92 = arith.addf %91, %90 : vector<8x128xf32>
    %93 = arith.divf %91, %92 : vector<8x128xf32>
    %94 = vector.extract_strided_slice %88 {offsets = [0, 64], sizes = [8, 32], strides = [1, 1]} : vector<8x128xf32> to vector<8x32xf32>
    %95 = math.tanh %94 : vector<8x32xf32>
    %96 = vector.extract_strided_slice %93 {offsets = [0, 0], sizes = [8, 32], strides = [1, 1]} : vector<8x128xf32> to vector<8x32xf32>
    %97 = vector.extract_strided_slice %93 {offsets = [0, 32], sizes = [8, 32], strides = [1, 1]} : vector<8x128xf32> to vector<8x32xf32>
    %98 = vector.extract_strided_slice %93 {offsets = [0, 96], sizes = [8, 32], strides = [1, 1]} : vector<8x128xf32> to vector<8x32xf32>
    %99 = arith.mulf %97, %83 : vector<8x32xf32>
    %100 = arith.mulf %96, %95 : vector<8x32xf32>
    %101 = arith.addf %99, %100 : vector<8x32xf32>
    %102 = math.tanh %101 : vector<8x32xf32>
    %103 = arith.mulf %98, %102 : vector<8x32xf32>
    %c32 = arith.constant 32 : index
    %c0_34 = arith.constant 0 : index
    %104 = vector.load %arg10[%c32, %c0_34] : memref<128x128xf32, #tpu.memory_space<vmem>>, vector<8x128xf32>
    %cst_35 = arith.constant dense<0.000000e+00> : vector<8x128xf32>
    %105 = tpu.matmul %103, %29, %cst_35 {dimension_numbers = #tpu.dot_dimension_numbers<[1], [0], [0], [1], [0, 0, 1, 1], [], []>} : vector<8x32xf32>, vector<32x128xf32>, vector<8x128xf32> -> vector<8x128xf32>
    %106 = arith.addf %104, %105 : vector<8x128xf32>
    %107 = arith.negf %106 : vector<8x128xf32>
    %108 = math.exp %107 : vector<8x128xf32>
    %cst_36 = arith.constant 1.000000e+00 : f32
    %109 = vector.broadcast %cst_36 : f32 to vector<8x128xf32>
    %110 = arith.addf %109, %108 : vector<8x128xf32>
    %111 = arith.divf %109, %110 : vector<8x128xf32>
    %112 = vector.extract_strided_slice %106 {offsets = [0, 64], sizes = [8, 32], strides = [1, 1]} : vector<8x128xf32> to vector<8x32xf32>
    %113 = math.tanh %112 : vector<8x32xf32>
    %114 = vector.extract_strided_slice %111 {offsets = [0, 0], sizes = [8, 32], strides = [1, 1]} : vector<8x128xf32> to vector<8x32xf32>
    %115 = vector.extract_strided_slice %111 {offsets = [0, 32], sizes = [8, 32], strides = [1, 1]} : vector<8x128xf32> to vector<8x32xf32>
    %116 = vector.extract_strided_slice %111 {offsets = [0, 96], sizes = [8, 32], strides = [1, 1]} : vector<8x128xf32> to vector<8x32xf32>
    %117 = arith.mulf %115, %101 : vector<8x32xf32>
    %118 = arith.mulf %114, %113 : vector<8x32xf32>
    %119 = arith.addf %117, %118 : vector<8x32xf32>
    %120 = math.tanh %119 : vector<8x32xf32>
    %121 = arith.mulf %116, %120 : vector<8x32xf32>
    %c40 = arith.constant 40 : index
    %c0_37 = arith.constant 0 : index
    %122 = vector.load %arg10[%c40, %c0_37] : memref<128x128xf32, #tpu.memory_space<vmem>>, vector<8x128xf32>
    %cst_38 = arith.constant dense<0.000000e+00> : vector<8x128xf32>
    %123 = tpu.matmul %121, %29, %cst_38 {dimension_numbers = #tpu.dot_dimension_numbers<[1], [0], [0], [1], [0, 0, 1, 1], [], []>} : vector<8x32xf32>, vector<32x128xf32>, vector<8x128xf32> -> vector<8x128xf32>
    %124 = arith.addf %122, %123 : vector<8x128xf32>
    %125 = arith.negf %124 : vector<8x128xf32>
    %126 = math.exp %125 : vector<8x128xf32>
    %cst_39 = arith.constant 1.000000e+00 : f32
    %127 = vector.broadcast %cst_39 : f32 to vector<8x128xf32>
    %128 = arith.addf %127, %126 : vector<8x128xf32>
    %129 = arith.divf %127, %128 : vector<8x128xf32>
    %130 = vector.extract_strided_slice %124 {offsets = [0, 64], sizes = [8, 32], strides = [1, 1]} : vector<8x128xf32> to vector<8x32xf32>
    %131 = math.tanh %130 : vector<8x32xf32>
    %132 = vector.extract_strided_slice %129 {offsets = [0, 0], sizes = [8, 32], strides = [1, 1]} : vector<8x128xf32> to vector<8x32xf32>
    %133 = vector.extract_strided_slice %129 {offsets = [0, 32], sizes = [8, 32], strides = [1, 1]} : vector<8x128xf32> to vector<8x32xf32>
    %134 = vector.extract_strided_slice %129 {offsets = [0, 96], sizes = [8, 32], strides = [1, 1]} : vector<8x128xf32> to vector<8x32xf32>
    %135 = arith.mulf %133, %119 : vector<8x32xf32>
    %136 = arith.mulf %132, %131 : vector<8x32xf32>
    %137 = arith.addf %135, %136 : vector<8x32xf32>
    %138 = math.tanh %137 : vector<8x32xf32>
    %139 = arith.mulf %134, %138 : vector<8x32xf32>
    %c48 = arith.constant 48 : index
    %c0_40 = arith.constant 0 : index
    %140 = vector.load %arg10[%c48, %c0_40] : memref<128x128xf32, #tpu.memory_space<vmem>>, vector<8x128xf32>
    %cst_41 = arith.constant dense<0.000000e+00> : vector<8x128xf32>
    %141 = tpu.matmul %139, %29, %cst_41 {dimension_numbers = #tpu.dot_dimension_numbers<[1], [0], [0], [1], [0, 0, 1, 1], [], []>} : vector<8x32xf32>, vector<32x128xf32>, vector<8x128xf32> -> vector<8x128xf32>
    %142 = arith.addf %140, %141 : vector<8x128xf32>
    %143 = arith.negf %142 : vector<8x128xf32>
    %144 = math.exp %143 : vector<8x128xf32>
    %cst_42 = arith.constant 1.000000e+00 : f32
    %145 = vector.broadcast %cst_42 : f32 to vector<8x128xf32>
    %146 = arith.addf %145, %144 : vector<8x128xf32>
    %147 = arith.divf %145, %146 : vector<8x128xf32>
    %148 = vector.extract_strided_slice %142 {offsets = [0, 64], sizes = [8, 32], strides = [1, 1]} : vector<8x128xf32> to vector<8x32xf32>
    %149 = math.tanh %148 : vector<8x32xf32>
    %150 = vector.extract_strided_slice %147 {offsets = [0, 0], sizes = [8, 32], strides = [1, 1]} : vector<8x128xf32> to vector<8x32xf32>
    %151 = vector.extract_strided_slice %147 {offsets = [0, 32], sizes = [8, 32], strides = [1, 1]} : vector<8x128xf32> to vector<8x32xf32>
    %152 = vector.extract_strided_slice %147 {offsets = [0, 96], sizes = [8, 32], strides = [1, 1]} : vector<8x128xf32> to vector<8x32xf32>
    %153 = arith.mulf %151, %137 : vector<8x32xf32>
    %154 = arith.mulf %150, %149 : vector<8x32xf32>
    %155 = arith.addf %153, %154 : vector<8x32xf32>
    %156 = math.tanh %155 : vector<8x32xf32>
    %157 = arith.mulf %152, %156 : vector<8x32xf32>
    %c56 = arith.constant 56 : index
    %c0_43 = arith.constant 0 : index
    %158 = vector.load %arg10[%c56, %c0_43] : memref<128x128xf32, #tpu.memory_space<vmem>>, vector<8x128xf32>
    %cst_44 = arith.constant dense<0.000000e+00> : vector<8x128xf32>
    %159 = tpu.matmul %157, %29, %cst_44 {dimension_numbers = #tpu.dot_dimension_numbers<[1], [0], [0], [1], [0, 0, 1, 1], [], []>} : vector<8x32xf32>, vector<32x128xf32>, vector<8x128xf32> -> vector<8x128xf32>
    %160 = arith.addf %158, %159 : vector<8x128xf32>
    %161 = arith.negf %160 : vector<8x128xf32>
    %162 = math.exp %161 : vector<8x128xf32>
    %cst_45 = arith.constant 1.000000e+00 : f32
    %163 = vector.broadcast %cst_45 : f32 to vector<8x128xf32>
    %164 = arith.addf %163, %162 : vector<8x128xf32>
    %165 = arith.divf %163, %164 : vector<8x128xf32>
    %166 = vector.extract_strided_slice %160 {offsets = [0, 64], sizes = [8, 32], strides = [1, 1]} : vector<8x128xf32> to vector<8x32xf32>
    %167 = math.tanh %166 : vector<8x32xf32>
    %168 = vector.extract_strided_slice %165 {offsets = [0, 0], sizes = [8, 32], strides = [1, 1]} : vector<8x128xf32> to vector<8x32xf32>
    %169 = vector.extract_strided_slice %165 {offsets = [0, 32], sizes = [8, 32], strides = [1, 1]} : vector<8x128xf32> to vector<8x32xf32>
    %170 = vector.extract_strided_slice %165 {offsets = [0, 96], sizes = [8, 32], strides = [1, 1]} : vector<8x128xf32> to vector<8x32xf32>
    %171 = arith.mulf %169, %155 : vector<8x32xf32>
    %172 = arith.mulf %168, %167 : vector<8x32xf32>
    %173 = arith.addf %171, %172 : vector<8x32xf32>
    %174 = math.tanh %173 : vector<8x32xf32>
    %175 = arith.mulf %170, %174 : vector<8x32xf32>
    %c64 = arith.constant 64 : index
    %c0_46 = arith.constant 0 : index
    %176 = vector.load %arg10[%c64, %c0_46] : memref<128x128xf32, #tpu.memory_space<vmem>>, vector<8x128xf32>
    %cst_47 = arith.constant dense<0.000000e+00> : vector<8x128xf32>
    %177 = tpu.matmul %175, %29, %cst_47 {dimension_numbers = #tpu.dot_dimension_numbers<[1], [0], [0], [1], [0, 0, 1, 1], [], []>} : vector<8x32xf32>, vector<32x128xf32>, vector<8x128xf32> -> vector<8x128xf32>
    %178 = arith.addf %176, %177 : vector<8x128xf32>
    %179 = arith.negf %178 : vector<8x128xf32>
    %180 = math.exp %179 : vector<8x128xf32>
    %cst_48 = arith.constant 1.000000e+00 : f32
    %181 = vector.broadcast %cst_48 : f32 to vector<8x128xf32>
    %182 = arith.addf %181, %180 : vector<8x128xf32>
    %183 = arith.divf %181, %182 : vector<8x128xf32>
    %184 = vector.extract_strided_slice %178 {offsets = [0, 64], sizes = [8, 32], strides = [1, 1]} : vector<8x128xf32> to vector<8x32xf32>
    %185 = math.tanh %184 : vector<8x32xf32>
    %186 = vector.extract_strided_slice %183 {offsets = [0, 0], sizes = [8, 32], strides = [1, 1]} : vector<8x128xf32> to vector<8x32xf32>
    %187 = vector.extract_strided_slice %183 {offsets = [0, 32], sizes = [8, 32], strides = [1, 1]} : vector<8x128xf32> to vector<8x32xf32>
    %188 = vector.extract_strided_slice %183 {offsets = [0, 96], sizes = [8, 32], strides = [1, 1]} : vector<8x128xf32> to vector<8x32xf32>
    %189 = arith.mulf %187, %173 : vector<8x32xf32>
    %190 = arith.mulf %186, %185 : vector<8x32xf32>
    %191 = arith.addf %189, %190 : vector<8x32xf32>
    %192 = math.tanh %191 : vector<8x32xf32>
    %193 = arith.mulf %188, %192 : vector<8x32xf32>
    %c72 = arith.constant 72 : index
    %c0_49 = arith.constant 0 : index
    %194 = vector.load %arg10[%c72, %c0_49] : memref<128x128xf32, #tpu.memory_space<vmem>>, vector<8x128xf32>
    %cst_50 = arith.constant dense<0.000000e+00> : vector<8x128xf32>
    %195 = tpu.matmul %193, %29, %cst_50 {dimension_numbers = #tpu.dot_dimension_numbers<[1], [0], [0], [1], [0, 0, 1, 1], [], []>} : vector<8x32xf32>, vector<32x128xf32>, vector<8x128xf32> -> vector<8x128xf32>
    %196 = arith.addf %194, %195 : vector<8x128xf32>
    %197 = arith.negf %196 : vector<8x128xf32>
    %198 = math.exp %197 : vector<8x128xf32>
    %cst_51 = arith.constant 1.000000e+00 : f32
    %199 = vector.broadcast %cst_51 : f32 to vector<8x128xf32>
    %200 = arith.addf %199, %198 : vector<8x128xf32>
    %201 = arith.divf %199, %200 : vector<8x128xf32>
    %202 = vector.extract_strided_slice %196 {offsets = [0, 64], sizes = [8, 32], strides = [1, 1]} : vector<8x128xf32> to vector<8x32xf32>
    %203 = math.tanh %202 : vector<8x32xf32>
    %204 = vector.extract_strided_slice %201 {offsets = [0, 0], sizes = [8, 32], strides = [1, 1]} : vector<8x128xf32> to vector<8x32xf32>
    %205 = vector.extract_strided_slice %201 {offsets = [0, 32], sizes = [8, 32], strides = [1, 1]} : vector<8x128xf32> to vector<8x32xf32>
    %206 = vector.extract_strided_slice %201 {offsets = [0, 96], sizes = [8, 32], strides = [1, 1]} : vector<8x128xf32> to vector<8x32xf32>
    %207 = arith.mulf %205, %191 : vector<8x32xf32>
    %208 = arith.mulf %204, %203 : vector<8x32xf32>
    %209 = arith.addf %207, %208 : vector<8x32xf32>
    %210 = math.tanh %209 : vector<8x32xf32>
    %211 = arith.mulf %206, %210 : vector<8x32xf32>
    %c80 = arith.constant 80 : index
    %c0_52 = arith.constant 0 : index
    %212 = vector.load %arg10[%c80, %c0_52] : memref<128x128xf32, #tpu.memory_space<vmem>>, vector<8x128xf32>
    %cst_53 = arith.constant dense<0.000000e+00> : vector<8x128xf32>
    %213 = tpu.matmul %211, %29, %cst_53 {dimension_numbers = #tpu.dot_dimension_numbers<[1], [0], [0], [1], [0, 0, 1, 1], [], []>} : vector<8x32xf32>, vector<32x128xf32>, vector<8x128xf32> -> vector<8x128xf32>
    %214 = arith.addf %212, %213 : vector<8x128xf32>
    %215 = arith.negf %214 : vector<8x128xf32>
    %216 = math.exp %215 : vector<8x128xf32>
    %cst_54 = arith.constant 1.000000e+00 : f32
    %217 = vector.broadcast %cst_54 : f32 to vector<8x128xf32>
    %218 = arith.addf %217, %216 : vector<8x128xf32>
    %219 = arith.divf %217, %218 : vector<8x128xf32>
    %220 = vector.extract_strided_slice %214 {offsets = [0, 64], sizes = [8, 32], strides = [1, 1]} : vector<8x128xf32> to vector<8x32xf32>
    %221 = math.tanh %220 : vector<8x32xf32>
    %222 = vector.extract_strided_slice %219 {offsets = [0, 0], sizes = [8, 32], strides = [1, 1]} : vector<8x128xf32> to vector<8x32xf32>
    %223 = vector.extract_strided_slice %219 {offsets = [0, 32], sizes = [8, 32], strides = [1, 1]} : vector<8x128xf32> to vector<8x32xf32>
    %224 = vector.extract_strided_slice %219 {offsets = [0, 96], sizes = [8, 32], strides = [1, 1]} : vector<8x128xf32> to vector<8x32xf32>
    %225 = arith.mulf %223, %209 : vector<8x32xf32>
    %226 = arith.mulf %222, %221 : vector<8x32xf32>
    %227 = arith.addf %225, %226 : vector<8x32xf32>
    %228 = math.tanh %227 : vector<8x32xf32>
    %229 = arith.mulf %224, %228 : vector<8x32xf32>
    %c88 = arith.constant 88 : index
    %c0_55 = arith.constant 0 : index
    %230 = vector.load %arg10[%c88, %c0_55] : memref<128x128xf32, #tpu.memory_space<vmem>>, vector<8x128xf32>
    %cst_56 = arith.constant dense<0.000000e+00> : vector<8x128xf32>
    %231 = tpu.matmul %229, %29, %cst_56 {dimension_numbers = #tpu.dot_dimension_numbers<[1], [0], [0], [1], [0, 0, 1, 1], [], []>} : vector<8x32xf32>, vector<32x128xf32>, vector<8x128xf32> -> vector<8x128xf32>
    %232 = arith.addf %230, %231 : vector<8x128xf32>
    %233 = arith.negf %232 : vector<8x128xf32>
    %234 = math.exp %233 : vector<8x128xf32>
    %cst_57 = arith.constant 1.000000e+00 : f32
    %235 = vector.broadcast %cst_57 : f32 to vector<8x128xf32>
    %236 = arith.addf %235, %234 : vector<8x128xf32>
    %237 = arith.divf %235, %236 : vector<8x128xf32>
    %238 = vector.extract_strided_slice %232 {offsets = [0, 64], sizes = [8, 32], strides = [1, 1]} : vector<8x128xf32> to vector<8x32xf32>
    %239 = math.tanh %238 : vector<8x32xf32>
    %240 = vector.extract_strided_slice %237 {offsets = [0, 0], sizes = [8, 32], strides = [1, 1]} : vector<8x128xf32> to vector<8x32xf32>
    %241 = vector.extract_strided_slice %237 {offsets = [0, 32], sizes = [8, 32], strides = [1, 1]} : vector<8x128xf32> to vector<8x32xf32>
    %242 = vector.extract_strided_slice %237 {offsets = [0, 96], sizes = [8, 32], strides = [1, 1]} : vector<8x128xf32> to vector<8x32xf32>
    %243 = arith.mulf %241, %227 : vector<8x32xf32>
    %244 = arith.mulf %240, %239 : vector<8x32xf32>
    %245 = arith.addf %243, %244 : vector<8x32xf32>
    %246 = math.tanh %245 : vector<8x32xf32>
    %247 = arith.mulf %242, %246 : vector<8x32xf32>
    %c96 = arith.constant 96 : index
    %c0_58 = arith.constant 0 : index
    %248 = vector.load %arg10[%c96, %c0_58] : memref<128x128xf32, #tpu.memory_space<vmem>>, vector<8x128xf32>
    %cst_59 = arith.constant dense<0.000000e+00> : vector<8x128xf32>
    %249 = tpu.matmul %247, %29, %cst_59 {dimension_numbers = #tpu.dot_dimension_numbers<[1], [0], [0], [1], [0, 0, 1, 1], [], []>} : vector<8x32xf32>, vector<32x128xf32>, vector<8x128xf32> -> vector<8x128xf32>
    %250 = arith.addf %248, %249 : vector<8x128xf32>
    %251 = arith.negf %250 : vector<8x128xf32>
    %252 = math.exp %251 : vector<8x128xf32>
    %cst_60 = arith.constant 1.000000e+00 : f32
    %253 = vector.broadcast %cst_60 : f32 to vector<8x128xf32>
    %254 = arith.addf %253, %252 : vector<8x128xf32>
    %255 = arith.divf %253, %254 : vector<8x128xf32>
    %256 = vector.extract_strided_slice %250 {offsets = [0, 64], sizes = [8, 32], strides = [1, 1]} : vector<8x128xf32> to vector<8x32xf32>
    %257 = math.tanh %256 : vector<8x32xf32>
    %258 = vector.extract_strided_slice %255 {offsets = [0, 0], sizes = [8, 32], strides = [1, 1]} : vector<8x128xf32> to vector<8x32xf32>
    %259 = vector.extract_strided_slice %255 {offsets = [0, 32], sizes = [8, 32], strides = [1, 1]} : vector<8x128xf32> to vector<8x32xf32>
    %260 = vector.extract_strided_slice %255 {offsets = [0, 96], sizes = [8, 32], strides = [1, 1]} : vector<8x128xf32> to vector<8x32xf32>
    %261 = arith.mulf %259, %245 : vector<8x32xf32>
    %262 = arith.mulf %258, %257 : vector<8x32xf32>
    %263 = arith.addf %261, %262 : vector<8x32xf32>
    %264 = math.tanh %263 : vector<8x32xf32>
    %265 = arith.mulf %260, %264 : vector<8x32xf32>
    %c104 = arith.constant 104 : index
    %c0_61 = arith.constant 0 : index
    %266 = vector.load %arg10[%c104, %c0_61] : memref<128x128xf32, #tpu.memory_space<vmem>>, vector<8x128xf32>
    %cst_62 = arith.constant dense<0.000000e+00> : vector<8x128xf32>
    %267 = tpu.matmul %265, %29, %cst_62 {dimension_numbers = #tpu.dot_dimension_numbers<[1], [0], [0], [1], [0, 0, 1, 1], [], []>} : vector<8x32xf32>, vector<32x128xf32>, vector<8x128xf32> -> vector<8x128xf32>
    %268 = arith.addf %266, %267 : vector<8x128xf32>
    %269 = arith.negf %268 : vector<8x128xf32>
    %270 = math.exp %269 : vector<8x128xf32>
    %cst_63 = arith.constant 1.000000e+00 : f32
    %271 = vector.broadcast %cst_63 : f32 to vector<8x128xf32>
    %272 = arith.addf %271, %270 : vector<8x128xf32>
    %273 = arith.divf %271, %272 : vector<8x128xf32>
    %274 = vector.extract_strided_slice %268 {offsets = [0, 64], sizes = [8, 32], strides = [1, 1]} : vector<8x128xf32> to vector<8x32xf32>
    %275 = math.tanh %274 : vector<8x32xf32>
    %276 = vector.extract_strided_slice %273 {offsets = [0, 0], sizes = [8, 32], strides = [1, 1]} : vector<8x128xf32> to vector<8x32xf32>
    %277 = vector.extract_strided_slice %273 {offsets = [0, 32], sizes = [8, 32], strides = [1, 1]} : vector<8x128xf32> to vector<8x32xf32>
    %278 = vector.extract_strided_slice %273 {offsets = [0, 96], sizes = [8, 32], strides = [1, 1]} : vector<8x128xf32> to vector<8x32xf32>
    %279 = arith.mulf %277, %263 : vector<8x32xf32>
    %280 = arith.mulf %276, %275 : vector<8x32xf32>
    %281 = arith.addf %279, %280 : vector<8x32xf32>
    %282 = math.tanh %281 : vector<8x32xf32>
    %283 = arith.mulf %278, %282 : vector<8x32xf32>
    %c112 = arith.constant 112 : index
    %c0_64 = arith.constant 0 : index
    %284 = vector.load %arg10[%c112, %c0_64] : memref<128x128xf32, #tpu.memory_space<vmem>>, vector<8x128xf32>
    %cst_65 = arith.constant dense<0.000000e+00> : vector<8x128xf32>
    %285 = tpu.matmul %283, %29, %cst_65 {dimension_numbers = #tpu.dot_dimension_numbers<[1], [0], [0], [1], [0, 0, 1, 1], [], []>} : vector<8x32xf32>, vector<32x128xf32>, vector<8x128xf32> -> vector<8x128xf32>
    %286 = arith.addf %284, %285 : vector<8x128xf32>
    %287 = arith.negf %286 : vector<8x128xf32>
    %288 = math.exp %287 : vector<8x128xf32>
    %cst_66 = arith.constant 1.000000e+00 : f32
    %289 = vector.broadcast %cst_66 : f32 to vector<8x128xf32>
    %290 = arith.addf %289, %288 : vector<8x128xf32>
    %291 = arith.divf %289, %290 : vector<8x128xf32>
    %292 = vector.extract_strided_slice %286 {offsets = [0, 64], sizes = [8, 32], strides = [1, 1]} : vector<8x128xf32> to vector<8x32xf32>
    %293 = math.tanh %292 : vector<8x32xf32>
    %294 = vector.extract_strided_slice %291 {offsets = [0, 0], sizes = [8, 32], strides = [1, 1]} : vector<8x128xf32> to vector<8x32xf32>
    %295 = vector.extract_strided_slice %291 {offsets = [0, 32], sizes = [8, 32], strides = [1, 1]} : vector<8x128xf32> to vector<8x32xf32>
    %296 = vector.extract_strided_slice %291 {offsets = [0, 96], sizes = [8, 32], strides = [1, 1]} : vector<8x128xf32> to vector<8x32xf32>
    %297 = arith.mulf %295, %281 : vector<8x32xf32>
    %298 = arith.mulf %294, %293 : vector<8x32xf32>
    %299 = arith.addf %297, %298 : vector<8x32xf32>
    %300 = math.tanh %299 : vector<8x32xf32>
    %301 = arith.mulf %296, %300 : vector<8x32xf32>
    %c120 = arith.constant 120 : index
    %c0_67 = arith.constant 0 : index
    %302 = vector.load %arg10[%c120, %c0_67] : memref<128x128xf32, #tpu.memory_space<vmem>>, vector<8x128xf32>
    %cst_68 = arith.constant dense<0.000000e+00> : vector<8x128xf32>
    %303 = tpu.matmul %301, %29, %cst_68 {dimension_numbers = #tpu.dot_dimension_numbers<[1], [0], [0], [1], [0, 0, 1, 1], [], []>} : vector<8x32xf32>, vector<32x128xf32>, vector<8x128xf32> -> vector<8x128xf32>
    %304 = arith.addf %302, %303 : vector<8x128xf32>
    %305 = arith.negf %304 : vector<8x128xf32>
    %306 = math.exp %305 : vector<8x128xf32>
    %cst_69 = arith.constant 1.000000e+00 : f32
    %307 = vector.broadcast %cst_69 : f32 to vector<8x128xf32>
    %308 = arith.addf %307, %306 : vector<8x128xf32>
    %309 = arith.divf %307, %308 : vector<8x128xf32>
    %310 = vector.extract_strided_slice %304 {offsets = [0, 64], sizes = [8, 32], strides = [1, 1]} : vector<8x128xf32> to vector<8x32xf32>
    %311 = math.tanh %310 : vector<8x32xf32>
    %312 = vector.extract_strided_slice %309 {offsets = [0, 0], sizes = [8, 32], strides = [1, 1]} : vector<8x128xf32> to vector<8x32xf32>
    %313 = vector.extract_strided_slice %309 {offsets = [0, 32], sizes = [8, 32], strides = [1, 1]} : vector<8x128xf32> to vector<8x32xf32>
    %314 = vector.extract_strided_slice %309 {offsets = [0, 96], sizes = [8, 32], strides = [1, 1]} : vector<8x128xf32> to vector<8x32xf32>
    %315 = arith.mulf %313, %299 : vector<8x32xf32>
    %316 = arith.mulf %312, %311 : vector<8x32xf32>
    %317 = arith.addf %315, %316 : vector<8x32xf32>
    %318 = math.tanh %317 : vector<8x32xf32>
    %319 = arith.mulf %314, %318 : vector<8x32xf32>
    %320 = vector.broadcast %12 : vector<8x1xf32> to vector<8x32xf32>
    %321 = arith.mulf %320, %319 : vector<8x32xf32>
    %cst_70 = arith.constant dense<0.000000e+00> : vector<32xf32>
    %322 = vector.multi_reduction <add>, %321, %cst_70 [0] : vector<8x32xf32> to vector<32xf32>
    %323 = vector.shape_cast %322 : vector<32xf32> to vector<1x32xf32>
    %324 = math.tanh %323 : vector<1x32xf32>
    %c0_71 = arith.constant 0 : index
    %c0_72 = arith.constant 0 : index
    %325 = vector.load %arg7[%c0_71, %c0_72] : memref<32x4xf32, #tpu.memory_space<vmem>>, vector<32x4xf32>
    %cst_73 = arith.constant dense<0.000000e+00> : vector<1x4xf32>
    %326 = tpu.matmul %324, %325, %cst_73 {dimension_numbers = #tpu.dot_dimension_numbers<[1], [0], [0], [1], [0, 0, 1, 1], [], []>} : vector<1x32xf32>, vector<32x4xf32>, vector<1x4xf32> -> vector<1x4xf32>
    %c0_74 = arith.constant 0 : index
    %c0_75 = arith.constant 0 : index
    %c0_76 = arith.constant 0 : index
    %327 = vector.load %arg8[%c0_74, %c0_75, %c0_76] : memref<1x1x4xf32, #tpu.memory_space<vmem>>, vector<1x1x4xf32>
    %328 = vector.shape_cast %327 : vector<1x1x4xf32> to vector<1x4xf32>
    %329 = vector.shape_cast %326 : vector<1x4xf32> to vector<1x1x4xf32>
    tpu.vector_store %arg8[%c0_74, %c0_75, %c0_76], %329 {strides = array<i32>} : memref<1x1x4xf32, #tpu.memory_space<vmem>>, vector<1x1x4xf32>,
    return
  }
  func.func @transform_0(%arg0: i32) -> (i32, i32, i32) {
    %c0_i32 = arith.constant 0 : i32
    %c0_i32_0 = arith.constant 0 : i32
    %c0_i32_1 = arith.constant 0 : i32
    return %arg0, %c0_i32, %c0_i32_0 : i32, i32, i32
  }
  func.func @transform_1(%arg0: i32) -> (i32, i32, i32) {
    %c0_i32 = arith.constant 0 : i32
    %c0_i32_0 = arith.constant 0 : i32
    %c0_i32_1 = arith.constant 0 : i32
    return %arg0, %c0_i32, %c0_i32_0 : i32, i32, i32
  }
  func.func @transform_2(%arg0: i32) -> (i32, i32) {
    %c0_i32 = arith.constant 0 : i32
    %c0_i32_0 = arith.constant 0 : i32
    %c0_i32_1 = arith.constant 0 : i32
    return %c0_i32, %c0_i32_0 : i32, i32
  }
  func.func @transform_3(%arg0: i32) -> (i32, i32) {
    %c0_i32 = arith.constant 0 : i32
    %c0_i32_0 = arith.constant 0 : i32
    %c0_i32_1 = arith.constant 0 : i32
    return %c0_i32, %c0_i32_0 : i32, i32
  }
  func.func @transform_4(%arg0: i32) -> (i32, i32) {
    %c0_i32 = arith.constant 0 : i32
    %c0_i32_0 = arith.constant 0 : i32
    %c0_i32_1 = arith.constant 0 : i32
    return %c0_i32, %c0_i32_0 : i32, i32
  }
  func.func @transform_5(%arg0: i32) -> (i32, i32) {
    %c0_i32 = arith.constant 0 : i32
    %c0_i32_0 = arith.constant 0 : i32
    %c0_i32_1 = arith.constant 0 : i32
    return %c0_i32, %c0_i32_0 : i32, i32
  }
  func.func @transform_6(%arg0: i32) -> (i32, i32) {
    %c0_i32 = arith.constant 0 : i32
    %c0_i32_0 = arith.constant 0 : i32
    %c0_i32_1 = arith.constant 0 : i32
    return %c0_i32, %c0_i32_0 : i32, i32
  }
  func.func @transform_7(%arg0: i32) -> (i32, i32, i32) {
    %c0_i32 = arith.constant 0 : i32
    %c0_i32_0 = arith.constant 0 : i32
    %c0_i32_1 = arith.constant 0 : i32
    return %arg0, %c0_i32, %c0_i32_0 : i32, i32, i32
  }
  func.func @transform_8(%arg0: i32) -> (i32, i32, i32) {
    %c0_i32 = arith.constant 0 : i32
    %c0_i32_0 = arith.constant 0 : i32
    %c0_i32_1 = arith.constant 0 : i32
    return %arg0, %c0_i32, %c0_i32_0 : i32, i32, i32
  }
}

</mosaic_0001>

<bundles_post_ra>
// kernel: neat_wpe_forward_batched.1
= control target key start
LH: loop header
LB: loop body
LE: loop exit
PB: predicated region body
PF: predicated region fallthrough
CT: control target
= control target key end

     0   :  { %14 = vsyncpa [#allocation4], 0  ;;  %s3790_s0 = inlined_call_operand.vmem [shape: s32[4,128,1], index: 0, kind: input, shape index: {}]   ;;  %s3791_s1 = inlined_call_operand.vmem [shape: s32[4,8,1], index: 1, kind: input, shape index: {}]   ;;  %s3792_s2 = inlined_call_operand.vmem [shape: f32[64,128], index: 2, kind: input, shape index: {}]   ;;  %s3793_s3 = inlined_call_operand.vmem [shape: f32[1,10], index: 3, kind: input, shape index: {}]   ;;  %s3794_s4 = inlined_call_operand.vmem [shape: f32[32,128], index: 4, kind: input, shape index: {}]   ;;  %s3795_s5 = inlined_call_operand.vmem [shape: f32[1,128], index: 5, kind: input, shape index: {}]   ;;  %s3796_s6 = inlined_call_operand.vmem [shape: f32[32,4], index: 6, kind: input, shape index: {}]   ;;  %s3797_s7 = inlined_call_operand.hbm [shape: f32[4,1,4], index: 7, kind: output, shape index: {0}]   ;;  %s3798_s8 = inlined_call_operand.vmem [shape: f32[4,8,1], index: 8, kind: output, shape index: {1}]  }
   0x1   :  { %16 = vsyncpa [#allocation4 + $0x1], 0  ;;  %s3225_s27 = smov 0   ;;  %s3227_s28 = smov 0  }
   0x2   :  { %s3229_s29 = smov 0   ;;  %s3231_s30 = smov 0  }
   0x3 LB: > { %s3246_s9 = sadd.s32 4294967295, %s3172_s30   ;;  %s2514_s10 = sadd.s32 4294967294, %s3172_s30   ;;  %s3172_s30 = sphi %s3231_s30, %s3804_s30   ;;  %s3168_s29 = sphi %s3229_s29, %s3803_s29   ;;  %s3164_s28 = sphi %s3227_s28, %s3802_s28   ;;  %s3160_s27 = sphi %s3225_s27, %s3801_s27  }
   0x4   : > { %s3250_s11 = sadd.s32 1, %s3172_s30   ;;  %s186_s12 = sadd.s32 1, %s3168_s29 }
   0x5   : > { %s183_s13 = ssub.s32 %s3172_s30, %s3250_s11  ;;  %p196_p0 = scmp.ne.s32.totalorder %s3168_s29, %s3164_s28 }
   0x6   : > { %p184_p1 = scmp.eq.s32.totalorder %s183_s13, 0  ;;  %p197_p2 = scmp.eq.s32.totalorder %s3246_s9, 3 }
   0x7   : > { %p202_p3 = scmp.ne.s32.totalorder %s3164_s28, %s3160_s27  ;;  %p203_p4 = scmp.eq.s32.totalorder %s2514_s10, 3 }
   0x8   : > { %s3261_s14 = scalar_select %p184_p1, %s3168_s29, %s186_s12  }
   0x9   : > { %p3263_p5 = por %p197_p2, %p196_p0  ;;  %p3267_p6 = por %p203_p4, %p202_p3 }
   0xa   : > { %p2517_p7 = scmp.ge.s32.totalorder %s3172_s30, 1  ;;  %p277_p8 = scmp.lt.s32.totalorder %s3172_s30, 5 }
   0xc   : > { %p278_p9 = pnand %p2517_p7, %p277_p8 }
   0xd   : > { %p318_p10 = scmp.lt.s32.totalorder (!%p278_p9), %s3246_s9, 3  ;;  %s3177_s25 = smov (!%p278_p9), 64  }
   0xe   : > { %281 = sbr.rel (%p278_p9) target bundleno = 11420 (0x2c9c), region = 48  ;;  %s310_s19 = sand.u32 (!%p278_p9), 1, %s3164_s28  }
   0xf   : > { %s311_s20 = scalar_lea.vmem (!%p278_p9), [#allocation3], %s310_s19 }
  0x13   : > { %v475_v0 = vld [vmem:[%s3792_s2 + $0x38] sm:$0xff]  ;;  %v474_v1 = vld [vmem:[%s3792_s2 + $0x30] sm:$0xff]  ;;  %v3174_v2 = vmov 0   ;;  %s3281_s21 = scalar_select %p318_p10, %s3246_s9, 3  ;;  %v473_v3 = vld [vmem:[%s3792_s2 + $0x28] sm:$0xff]  ;;  %v3175_v4 = vmov 0.0   ;;  %v332_v16 = vlaneseq }
  0x14   : > { %2973 = vset.pattern.permute.xlu0 %v3174_v2  ;;  %2702 = vmatprep.subr.mxu0 %v475_v0  ;;  %v3290_v5 = vld [vmem:[%s3794_s4 + $0x18] sm:$0xff]  ;;  %v472_v6 = vld [vmem:[%s3792_s2 + $0x20] sm:$0xff]  ;;  %v3306_v7 = vld [vmem:[%s3794_s4 + $0x10] sm:$0xff]  ;;  %vm3176_vm0 = vmmov 0   ;;  %vm483_vm1 = vcmask 523264   ;;  %vm698_vm4 = vcmask 261120  }
  0x15   : > { %2703 = vmatpush3.msra.mxu0 %v475_v0  ;;  %2974 = vset.pattern.permute.xlu1 %v3174_v2  ;;  %s2592_s26 = sshll.u32 %s3281_s21, 7  ;;  %v471_v9 = vld [vmem:[%s3792_s2 + $0x18] sm:$0xff]  ;;  %v3316_v10 = vld [vmem:[%s3794_s4 + $0x8] sm:$0xff]  ;;  %v470_v12 = vld [vmem:[%s3792_s2 + $0x10] sm:$0xff]  ;;  %v3352_v17 = vand.u32 127, %v332_v16 }
  0x16   : > { %2704 = vmatprep.subr.mxu0 %v474_v1  ;;  %2742 = vmatprep.subr.mxu1 %v3175_v4  ;;  %s3300_s18 = scalar_lea.vmem %s3790_s0, %s2592_s26  ;;  %v3327_v13 = vld [vmem:[%s3794_s4] sm:$0xff]  ;;  %v469_v14 = vld [vmem:[%s3792_s2 + $0x8] sm:$0xff]  ;;  %s3178_s26 = smov 32  }
  0x17   : > { %2705 = vmatpush3.msra.mxu0 %v474_v1  ;;  %2743 = vmatpush3.msra.mxu1 %v3290_v5  ;;  %v356_v8 = vld [vmem:[%s3300_s18] sm:$0xff]  ;;  %v357_v11 = vld [vmem:[%s3300_s18 + $0x8] sm:$0xff]  ;;  %v358_v54 = vld [vmem:[%s3300_s18 + $0x10] sm:$0xff] }
  0x18   : > { %2706 = vmatprep.subr.mxu0 %v473_v3  ;;  %2744 = vmatprep.subr.mxu1 %v3175_v4  ;;  %v468_v15 = vld [vmem:[%s3792_s2] sm:$0xff]  ;;  %v359_v61 = vld [vmem:[%s3300_s18 + $0x18] sm:$0xff] }
  0x19   : > { %2707 = vmatpush3.msra.mxu0 %v473_v3  ;;  %2745 = vmatpush3.msra.mxu1 %v3306_v7  ;;  %v3371_v25 = vld [vmem:[%s3795_s5] ss:$0 sm:$0xff] }
  0x1a   : > { %373 = vperm.xlu0 %2973, %v356_v8   ;;  %2708 = vmatprep.subr.mxu0 %v472_v6 }
  0x1b   : > { %2709 = vmatpush3.msra.mxu0 %v472_v6  ;;  %2746 = vmatprep.subr.mxu1 %v3175_v4 }
  0x1c   : > { %2710 = vmatprep.subr.mxu0 %v471_v9  ;;  %2747 = vmatpush3.msra.mxu1 %v3316_v10 }
  0x1d   : > { %2711 = vmatpush3.msra.mxu0 %v471_v9  ;;  %2748 = vmatprep.subr.mxu1 %v3175_v4 }
  0x1e   : > { %376 = vperm.xlu0 %2973, %v357_v11   ;;  %2712 = vmatprep.subr.mxu0 %v470_v12 }
  0x1f   : > { %2713 = vmatpush3.msra.mxu0 %v470_v12  ;;  %2749 = vmatpush3.msra.mxu1 %v3327_v13 }
  0x20   : > { %2714 = vmatprep.subr.mxu0 %v469_v14  ;;  %2750 = vmatprep.mubr.msk.f32.mxu1 %vm3176_vm0, %v3175_v4 }
  0x21   : > { %2715 = vmatpush3.msra.mxu0 %v469_v14  ;;  %2751 = vmatmul.mubr.f32.vlgmr.msra.gmra.mxu1 %v3175_v4 }
  0x22   : > { %2716 = vmatprep.subr.mxu0 %v468_v15  ;;  %2753 = vmatprep.subr.mxu1 %v3175_v4 }
  0x23   : > { %2717 = vmatpush3.msra.mxu0 %v468_v15  ;;  %2754 = vmatpush3.msra.mxu1 %v3290_v5 }
  0x24   : > { %2755 = vmatprep.subr.mxu1 %v3175_v4  ;;  %2761 = vmatprep.mubr.msk.f32.mxu1 %vm3176_vm0, %v3175_v4 }
  0x25   : > { %2756 = vmatpush3.msra.mxu1 %v3306_v7  ;;  %2797 = vmatprep.subr.mxu0 %v3175_v4 }
  0x26   : > { %2757 = vmatprep.subr.mxu1 %v3175_v4 }
  0x27   : > { %2758 = vmatpush3.msra.mxu1 %v3316_v10 }
  0x28   : > { %2759 = vmatprep.subr.mxu1 %v3175_v4 }
  0x29   : > { %2760 = vmatpush3.msra.mxu1 %v3327_v13 }
  0x2a   : > { %2764 = vmatprep.subr.mxu1 %v3175_v4 }
  0x95   : > { %v374_v18 = vpop.permute.xlu0 %373 }
  0x96   : > { %vm420_vm2 = vcmp.eq.s32.totalorder %v374_v18, %v3352_v17 }
  0x97   : > { %v2524_v19 = vsel %vm420_vm2, 1.0, %v3175_v4 }
  0x98   : > { %2718 = vmatprep.mubr.msk.f32.mxu0 %vm483_vm1, %v2524_v19 }
  0x99   : > { %v377_v20 = vpop.permute.xlu0 %376 }
  0x9a   : > { %vm421_vm3 = vcmp.eq.s32.totalorder %v377_v20, %v3352_v17 }
  0x9b   : > { %v2525_v21 = vsel %vm421_vm3, 1.0, %v3175_v4 }
  0x9c   : > { %2719 = vmatmul.mubr.msk.f32.vlgmr.msra.gmra.mxu0 %vm483_vm1, %v2525_v21 }
  0x9d   : > { %2798 = vmatpush3.msra.mxu0 %v3290_v5 }
  0x9e   : > { %2799 = vmatprep.subr.mxu0 %v3175_v4 }
  0x9f   : > { %2800 = vmatpush3.msra.mxu0 %v3306_v7 }
  0xa0   : > { %2801 = vmatprep.subr.mxu0 %v3175_v4 }
  0xa1   : > { %2802 = vmatpush3.msra.mxu0 %v3316_v10 }
  0xa2   : > { %2803 = vmatprep.subr.mxu0 %v3175_v4 }
  0xa3   : > { %2804 = vmatpush3.msra.mxu0 %v3327_v13 }
  0xa4   : > { %2819 = vmatprep.subr.mxu0 %v3175_v4 }
  0xe1   : > { %v768_v22 = vpop.f32.mrf.mxu1 }
  0xe3   : > { %v2752_v23 = vpop.f32.mrf.mxu1 }
 0x15c   : > { %v2720_v24 = vpop.f32.mrf.mxu0 }
 0x15d   : > { %v604_v43 = vadd.f32 %v2720_v24, %v3371_v25 }
 0x15e   : > { %v598_v26 = vpop.f32.mrf.mxu0 }
 0x15f   : > { %v599_v27 = vadd.f32 %v3371_v25, %v598_v26 }
 0x161   : > { %v772_v28 = vadd.f32 %v768_v22, %v599_v27 }
 0x163   : > { %2975 = vtanh.f32 %v772_v28  ;;  %v2557_v30 = vmul.f32 -1.442695, %v772_v28 }
 0x165   : > { %2977 = vpow2.f32 %v2557_v30 }
 0x170   : > { %v2976_v29 = vpop.eup %2975 }
 0x171   : > { %782 = vrot.lane.b32.xlu1 %v2976_v29, %s3177_s25 }
 0x172   : > { %v2978_v31 = vpop.eup %2977 }
 0x173   : > { %v776_v32 = vadd.f32 1.0, %v2978_v31 }
 0x175   : > { %2979 = vrcp.f32 %v776_v32 }
 0x182   : > { %v2980_v33 = vpop.eup %2979 }
 0x183   : > { %v780_v36 = vmul.f32 0.0, %v2980_v33 }
 0x1e3   : > { %v783_v34 = vpop.permute.xlu1 %782 }
 0x1e4   : > { %v785_v35 = vmul.f32 %v2980_v33, %v783_v34 }
 0x1e6   : > { %787 = vrot.lane.b32.xlu1 %v785_v35, %s3178_s26 }
 0x258   : > { %v788_v37 = vpop.permute.xlu1 %787 }
 0x259   : > { %v790_v38 = vadd.f32 %v788_v37, %v780_v36 }
 0x25b   : > { %2981 = vtanh.f32 %v790_v38 }
 0x268   : > { %v2982_v39 = vpop.eup %2981 }
 0x269   : > { %793 = vrot.lane.b32.xlu0 %v2982_v39, %s3177_s25 }
 0x2db   : > { %v794_v40 = vpop.permute.xlu0 %793 }
 0x2dc   : > { %v796_v41 = vmul.f32 %v2980_v33, %v794_v40 }
 0x2de   : > { %799 = vrot.lane.b32.xlu1 %v796_v41, %s3178_s26  ;;  %v360_v41 = vld [vmem:[%s3300_s18 + $0x20] sm:$0xff] }
 0x350   : > { %v800_v42 = vpop.permute.xlu1 %799 }
 0x351   : > { %2762 = vmatmul.mubr.msk.f32.vlgmr.msra.gmra.mxu1 %vm698_vm4, %v800_v42 }
 0x352   : > { %2765 = vmatpush3.msra.mxu1 %v3290_v5  ;;  %2772 = vmatprep.mubr.msk.f32.mxu1 %vm3176_vm0, %v3175_v4 }
 0x353   : > { %2766 = vmatprep.subr.mxu1 %v3175_v4 }
 0x354   : > { %2767 = vmatpush3.msra.mxu1 %v3306_v7 }
 0x355   : > { %2768 = vmatprep.subr.mxu1 %v3175_v4 }
 0x356   : > { %2769 = vmatpush3.msra.mxu1 %v3316_v10 }
 0x357   : > { %2770 = vmatprep.subr.mxu1 %v3175_v4 }
 0x358   : > { %2771 = vmatpush3.msra.mxu1 %v3327_v13 }
 0x359   : > { %2775 = vmatprep.subr.mxu1 %v3175_v4 }
 0x411   : > { %v869_v44 = vpop.f32.mrf.mxu1 }
 0x412   : > { %v873_v45 = vadd.f32 %v869_v44, %v604_v43 }
 0x413   : > { %v2763_v46 = vpop.f32.mrf.mxu1 }
 0x414   : > { %2983 = vtanh.f32 %v873_v45  ;;  %v2559_v48 = vmul.f32 -1.442695, %v873_v45 }
 0x416   : > { %2985 = vpow2.f32 %v2559_v48  ;;  %v361_v48 = vld [vmem:[%s3300_s18 + $0x28] sm:$0xff] }
 0x421   : > { %v2984_v47 = vpop.eup %2983 }
 0x422   : > { %883 = vrot.lane.b32.xlu0 %v2984_v47, %s3177_s25 }
 0x423   : > { %v2986_v49 = vpop.eup %2985 }
 0x424   : > { %v877_v50 = vadd.f32 1.0, %v2986_v49 }
 0x426   : > { %2987 = vrcp.f32 %v877_v50 }
 0x433   : > { %v2988_v51 = vpop.eup %2987 }
 0x434   : > { %v881_v55 = vmul.f32 %v2988_v51, %v790_v38 }
 0x494   : > { %v884_v52 = vpop.permute.xlu0 %883 }
 0x495   : > { %v886_v53 = vmul.f32 %v2988_v51, %v884_v52 }
 0x497   : > { %888 = vrot.lane.b32.xlu1 %v886_v53, %s3178_s26 }
 0x49b   : > { %379 = vperm.xlu1 %2974, %v358_v54  }
 0x509   : > { %v889_v56 = vpop.permute.xlu1 %888 }
 0x50a   : > { %v891_v57 = vadd.f32 %v889_v56, %v881_v55 }
 0x50c   : > { %2989 = vtanh.f32 %v891_v57 }
 0x516   : > { %v380_v58 = vpop.permute.xlu1 %379 }
 0x517   : > { %vm422_vm5 = vcmp.eq.s32.totalorder %v380_v58, %v3352_v17 }
 0x518   : > { %v2526_v59 = vsel %vm422_vm5, 1.0, %v3175_v4 }
 0x519   : > { %v2990_v60 = vpop.eup %2989  ;;  %2721 = vmatprep.mubr.msk.f32.mxu0 %vm483_vm1, %v2526_v59 }
 0x51a   : > { %894 = vrot.lane.b32.xlu0 %v2990_v60, %s3177_s25 }
 0x51e   : > { %382 = vperm.xlu0 %2973, %v359_v61  }
 0x58c   : > { %v895_v62 = vpop.permute.xlu0 %894 }
 0x58d   : > { %v897_v63 = vmul.f32 %v2988_v51, %v895_v62 }
 0x58f   : > { %900 = vrot.lane.b32.xlu1 %v897_v63, %s3178_s26 }
 0x599   : > { %v383_v0 = vpop.permute.xlu0 %382 }
 0x59a   : > { %vm423_vm6 = vcmp.eq.s32.totalorder %v383_v0, %v3352_v17 }
 0x59b   : > { %v2527_v1 = vsel %vm423_vm6, 1.0, %v3175_v4  ;;  %vm354_vm6 = vcmask 7168  }
 0x59c   : > { %2722 = vmatmul.mubr.msk.f32.gmra.mxu0 %vm483_vm1, %v2527_v1 }
 0x601   : > { %v901_v2 = vpop.permute.xlu1 %900 }
 0x602   : > { %2773 = vmatmul.mubr.msk.f32.vlgmr.msra.gmra.mxu1 %vm698_vm4, %v901_v2 }
 0x603   : > { %2776 = vmatpush3.msra.mxu1 %v3290_v5  ;;  %2783 = vmatprep.mubr.msk.f32.mxu1 %vm3176_vm0, %v3175_v4 }
 0x604   : > { %2777 = vmatprep.subr.mxu1 %v3175_v4 }
 0x605   : > { %2778 = vmatpush3.msra.mxu1 %v3306_v7 }
 0x606   : > { %2779 = vmatprep.subr.mxu1 %v3175_v4 }
 0x607   : > { %2780 = vmatpush3.msra.mxu1 %v3316_v10 }
 0x608   : > { %2781 = vmatprep.subr.mxu1 %v3175_v4 }
 0x609   : > { %2782 = vmatpush3.msra.mxu1 %v3327_v13 }
 0x60a   : > { %2786 = vmatprep.subr.mxu1 %v3175_v4 }
 0x65c   : > { %v2723_v3 = vpop.f32.mrf.mxu0 }
 0x65d   : > { %v614_v30 = vadd.f32 %v2723_v3, %v3371_v25  ;;  %v362_v3 = vld [vmem:[%s3300_s18 + $0x30] sm:$0xff] }
 0x65e   : > { %v608_v6 = vpop.f32.mrf.mxu0 }
 0x65f   : > { %v609_v8 = vadd.f32 %v3371_v25, %v608_v6  ;;  %v364_v6 = vld [vmem:[%s3300_s18 + $0x40] sm:$0xff] }
 0x6c2   : > { %v970_v9 = vpop.f32.mrf.mxu1 }
 0x6c3   : > { %v974_v11 = vadd.f32 %v970_v9, %v609_v8  ;;  %v366_v8 = vld [vmem:[%s3300_s18 + $0x50] sm:$0xff]  ;;  %v368_v9 = vld [vmem:[%s3300_s18 + $0x60] sm:$0xff] }
 0x6c4   : > { %v2774_v12 = vpop.f32.mrf.mxu1 }
 0x6c5   : > { %2991 = vtanh.f32 %v974_v11  ;;  %v2561_v15 = vmul.f32 -1.442695, %v974_v11  ;;  %v370_v11 = vld [vmem:[%s3300_s18 + $0x70] sm:$0xff] }
 0x6c7   : > { %2993 = vpow2.f32 %v2561_v15 }
 0x6d2   : > { %v2992_v14 = vpop.eup %2991 }
 0x6d3   : > { %984 = vrot.lane.b32.xlu0 %v2992_v14, %s3177_s25 }
 0x6d4   : > { %v2994_v16 = vpop.eup %2993 }
 0x6d5   : > { %v978_v18 = vadd.f32 1.0, %v2994_v16 }
 0x6d7   : > { %2995 = vrcp.f32 %v978_v18 }
 0x6e4   : > { %v2996_v19 = vpop.eup %2995 }
 0x6e5   : > { %v982_v22 = vmul.f32 %v2996_v19, %v891_v57 }
 0x745   : > { %v985_v20 = vpop.permute.xlu0 %984 }
 0x746   : > { %v987_v21 = vmul.f32 %v2996_v19, %v985_v20  ;;  %v363_v20 = vld [vmem:[%s3300_s18 + $0x38] sm:$0xff] }
 0x748   : > { %989 = vrot.lane.b32.xlu1 %v987_v21, %s3178_s26  ;;  %v365_v21 = vld [vmem:[%s3300_s18 + $0x48] sm:$0xff] }
 0x7ba   : > { %v990_v23 = vpop.permute.xlu1 %989 }
 0x7bb   : > { %v992_v24 = vadd.f32 %v990_v23, %v982_v22  ;;  %v367_v22 = vld [vmem:[%s3300_s18 + $0x58] sm:$0xff]  ;;  %v369_v23 = vld [vmem:[%s3300_s18 + $0x68] sm:$0xff] }
 0x7bd   : > { %2997 = vtanh.f32 %v992_v24 }
 0x7ca   : > { %v2998_v26 = vpop.eup %2997 }
 0x7cb   : > { %995 = vrot.lane.b32.xlu0 %v2998_v26, %s3177_s25 }
 0x83d   : > { %v996_v27 = vpop.permute.xlu0 %995 }
 0x83e   : > { %v998_v28 = vmul.f32 %v2996_v19, %v996_v27 }
 0x840   : > { %1001 = vrot.lane.b32.xlu1 %v998_v28, %s3178_s26 }
 0x8b2   : > { %v1002_v29 = vpop.permute.xlu1 %1001 }
 0x8b3   : > { %2784 = vmatmul.mubr.msk.f32.vlgmr.msra.gmra.mxu1 %vm698_vm4, %v1002_v29 }
 0x8b4   : > { %2787 = vmatpush3.msra.mxu1 %v3290_v5  ;;  %2794 = vmatprep.mubr.msk.f32.mxu1 %vm3176_vm0, %v3175_v4 }
 0x8b5   : > { %2788 = vmatprep.subr.mxu1 %v3175_v4 }
 0x8b6   : > { %2789 = vmatpush3.msra.mxu1 %v3306_v7 }
 0x8b7   : > { %2790 = vmatprep.subr.mxu1 %v3175_v4 }
 0x8b8   : > { %2791 = vmatpush3.msra.mxu1 %v3316_v10 }
 0x8b9   : > { %2792 = vmatprep.subr.mxu1 %v3175_v4 }
 0x8ba   : > { %2793 = vmatpush3.msra.mxu1 %v3327_v13 }
 0x8bb   : > { %2808 = vmatprep.subr.mxu1 %v3175_v4 }
 0x973   : > { %v1071_v31 = vpop.f32.mrf.mxu1 }
 0x974   : > { %v1075_v32 = vadd.f32 %v1071_v31, %v614_v30 }
 0x975   : > { %v2785_v33 = vpop.f32.mrf.mxu1 }
 0x976   : > { %2999 = vtanh.f32 %v1075_v32  ;;  %v2563_v35 = vmul.f32 -1.442695, %v1075_v32 }
 0x978   : > { %3001 = vpow2.f32 %v2563_v35 }
 0x983   : > { %v3000_v34 = vpop.eup %2999 }
 0x984   : > { %1085 = vrot.lane.b32.xlu0 %v3000_v34, %s3177_s25 }
 0x985   : > { %v3002_v36 = vpop.eup %3001 }
 0x986   : > { %v1079_v37 = vadd.f32 1.0, %v3002_v36 }
 0x988   : > { %3003 = vrcp.f32 %v1079_v37 }
 0x995   : > { %v3004_v38 = vpop.eup %3003 }
 0x996   : > { %v1083_v42 = vmul.f32 %v3004_v38, %v992_v24  ;;  %v371_v24 = vld [vmem:[%s3300_s18 + $0x78] sm:$0xff]  ;;  %s2520_s18 = sshll.u32 %s3281_s21, 3  ;;  %s2589_s21 = sshll.u32 %s3246_s9, 4 }
 0x997   : > { %s326_s13 = scalar_lea.vmem %s3791_s1, %s2520_s18  ;;  %s330_s22 = scalar_lea.vmem %s3798_s8, %s2520_s18 }
 0x998   : > { %s3749_s18 = scalar_lea.hbm %s3797_s7, %s2589_s21  ;;  %s3179_s9 = smov [#allocation3]  }
 0x999   : > { %s3116_s12 = sshll.u32 %s3179_s9, 4  ;;  %s3117_s12 = int_to_ptr.vmem [resolvable:$false] %s3116_s12 }
 0x9f6   : > { %v1086_v39 = vpop.permute.xlu0 %1085 }
 0x9f7   : > { %v1088_v40 = vmul.f32 %v3004_v38, %v1086_v39 }
 0x9f9   : > { %1090 = vrot.lane.b32.xlu1 %v1088_v40, %s3178_s26 }
 0x9fd   : > { %385 = vperm.xlu1 %2974, %v360_v41  }
 0xa6b   : > { %v1091_v43 = vpop.permute.xlu1 %1090 }
 0xa6c   : > { %v1093_v44 = vadd.f32 %v1091_v43, %v1083_v42 }
 0xa6e   : > { %3005 = vtanh.f32 %v1093_v44 }
 0xa78   : > { %v386_v45 = vpop.permute.xlu1 %385 }
 0xa79   : > { %vm424_vm7 = vcmp.eq.s32.totalorder %v386_v45, %v3352_v17 }
 0xa7a   : > { %v2528_v46 = vsel %vm424_vm7, 1.0, %v3175_v4  ;;  %vm2313_vm7 = vcmask 1048320  }
 0xa7b   : > { %v3006_v47 = vpop.eup %3005  ;;  %2724 = vmatprep.mubr.msk.f32.mxu0 %vm483_vm1, %v2528_v46 }
 0xa7c   : > { %1096 = vrot.lane.b32.xlu0 %v3006_v47, %s3177_s25 }
 0xa80   : > { %388 = vperm.xlu0 %2973, %v361_v48  }
 0xaee   : > { %v1097_v49 = vpop.permute.xlu0 %1096 }
 0xaef   : > { %v1099_v50 = vmul.f32 %v3004_v38, %v1097_v49 }
 0xaf1   : > { %1102 = vrot.lane.b32.xlu1 %v1099_v50, %s3178_s26 }
 0xafb   : > { %v389_v51 = vpop.permute.xlu0 %388 }
 0xafc   : > { %vm425_vm8 = vcmp.eq.s32.totalorder %v389_v51, %v3352_v17 }
 0xafd   : > { %v2529_v52 = vsel %vm425_vm8, 1.0, %v3175_v4  ;;  %vm2401_vm8 = vcmask 24576  }
 0xafe   : > { %2725 = vmatmul.mubr.msk.f32.gmra.mxu0 %vm483_vm1, %v2529_v52 }
 0xb63   : > { %v1103_v53 = vpop.permute.xlu1 %1102 }
 0xb64   : > { %2795 = vmatmul.mubr.msk.f32.vlgmr.msra.gmra.mxu1 %vm698_vm4, %v1103_v53 }
 0xb65   : > { %2809 = vmatpush3.msra.mxu1 %v3290_v5  ;;  %2816 = vmatprep.mubr.msk.f32.mxu1 %vm3176_vm0, %v3175_v4 }
 0xb66   : > { %2810 = vmatprep.subr.mxu1 %v3175_v4 }
 0xb67   : > { %2811 = vmatpush3.msra.mxu1 %v3306_v7 }
 0xb68   : > { %2812 = vmatprep.subr.mxu1 %v3175_v4 }
 0xb69   : > { %2813 = vmatpush3.msra.mxu1 %v3316_v10 }
 0xb6a   : > { %2814 = vmatprep.subr.mxu1 %v3175_v4 }
 0xb6b   : > { %2815 = vmatpush3.msra.mxu1 %v3327_v13 }
 0xb6c   : > { %2830 = vmatprep.subr.mxu1 %v3175_v4 }
 0xbbe   : > { %v3453_v54 = vpop.f32.mrf.mxu0 }
 0xbc0   : > { %v618_v55 = vpop.f32.mrf.mxu0 }
 0xbc1   : > { %v619_v56 = vadd.f32 %v3371_v25, %v618_v55 }
 0xc24   : > { %v1172_v57 = vpop.f32.mrf.mxu1 }
 0xc25   : > { %v1176_v58 = vadd.f32 %v1172_v57, %v619_v56 }
 0xc26   : > { %v2796_v59 = vpop.f32.mrf.mxu1 }
 0xc27   : > { %3007 = vtanh.f32 %v1176_v58  ;;  %v2565_v61 = vmul.f32 -1.442695, %v1176_v58  ;;  %v624_v58 = vadd.f32 %v3453_v54, %v3371_v25 }
 0xc29   : > { %3009 = vpow2.f32 %v2565_v61 }
 0xc34   : > { %v3008_v60 = vpop.eup %3007 }
 0xc35   : > { %1186 = vrot.lane.b32.xlu0 %v3008_v60, %s3177_s25 }
 0xc36   : > { %v3010_v62 = vpop.eup %3009 }
 0xc37   : > { %v1180_v63 = vadd.f32 1.0, %v3010_v62 }
 0xc39   : > { %3011 = vrcp.f32 %v1180_v63 }
 0xc46   : > { %v3012_v0 = vpop.eup %3011 }
 0xc47   : > { %v1184_v12 = vmul.f32 %v3012_v0, %v1093_v44 }
 0xca7   : > { %v1187_v1 = vpop.permute.xlu0 %1186 }
 0xca8   : > { %v1189_v2 = vmul.f32 %v3012_v0, %v1187_v1 }
 0xcaa   : > { %1191 = vrot.lane.b32.xlu1 %v1189_v2, %s3178_s26 }
 0xcae   : > { %391 = vperm.xlu1 %2974, %v362_v3  }
 0xcb2   : > { %397 = vperm.xlu1 %2974, %v364_v6  }
 0xcb6   : > { %403 = vperm.xlu1 %2974, %v366_v8  }
 0xcba   : > { %409 = vperm.xlu1 %2974, %v368_v9  }
 0xcbe   : > { %415 = vperm.xlu1 %2974, %v370_v11  }
 0xd1c   : > { %v1192_v14 = vpop.permute.xlu1 %1191 }
 0xd1d   : > { %v3463_v15 = vadd.f32 %v1192_v14, %v1184_v12 }
 0xd1f   : > { %3013 = vtanh.f32 %v3463_v15 }
 0xd29   : > { %v392_v16 = vpop.permute.xlu1 %391 }
 0xd2a   : > { %vm426_vm9 = vcmp.eq.s32.totalorder %v392_v16, %v3352_v17 }
 0xd2b   : > { %v2530_v18 = vsel %vm426_vm9, 1.0, %v3175_v4 }
 0xd2c   : > { %v3014_v19 = vpop.eup %3013  ;;  %2727 = vmatprep.mubr.msk.f32.mxu0 %vm483_vm1, %v2530_v18 }
 0xd2d   : > { %1197 = vrot.lane.b32.xlu0 %v3014_v19, %s3177_s25  ;;  %v398_v28 = vpop.permute.xlu1 %397 }
 0xd2e   : > { %vm428_vm10 = vcmp.eq.s32.totalorder %v398_v28, %v3352_v17 }
 0xd2f   : > { %v2532_v32 = vsel %vm428_vm10, 1.0, %v3175_v4 }
 0xd31   : > { %394 = vperm.xlu0 %2973, %v363_v20   ;;  %v404_v29 = vpop.permute.xlu1 %403 }
 0xd32   : > { %vm430_vm12 = vcmp.eq.s32.totalorder %v404_v29, %v3352_v17 }
 0xd33   : > { %v2534_v36 = vsel %vm430_vm12, 1.0, %v3175_v4 }
 0xd35   : > { %400 = vperm.xlu0 %2973, %v365_v21   ;;  %v410_v33 = vpop.permute.xlu1 %409 }
 0xd36   : > { %vm432_vm14 = vcmp.eq.s32.totalorder %v410_v33, %v3352_v17 }
 0xd37   : > { %v2536_v40 = vsel %vm432_vm14, 1.0, %v3175_v4 }
 0xd39   : > { %406 = vperm.xlu0 %2973, %v367_v22   ;;  %v416_v38 = vpop.permute.xlu1 %415 }
 0xd3a   : > { %vm434_vm2 = vcmp.eq.s32.totalorder %v416_v38, %v3352_v17 }
 0xd3b   : > { %v2538_v43 = vsel %vm434_vm2, 1.0, %v3175_v4 }
 0xd3d   : > { %412 = vperm.xlu0 %2973, %v369_v23  }
 0xd41   : > { %418 = vperm.xlu0 %2973, %v371_v24  }
 0xd9f   : > { %v1198_v26 = vpop.permute.xlu0 %1197 }
 0xda0   : > { %v1200_v27 = vmul.f32 %v3012_v0, %v1198_v26 }
 0xda2   : > { %1203 = vrot.lane.b32.xlu1 %v1200_v27, %s3178_s26 }
 0xdac   : > { %v395_v30 = vpop.permute.xlu0 %394 }
 0xdad   : > { %vm427_vm11 = vcmp.eq.s32.totalorder %v395_v30, %v3352_v17 }
 0xdae   : > { %v2531_v31 = vsel %vm427_vm11, 1.0, %v3175_v4 }
 0xdaf   : > { %2728 = vmatmul.mubr.msk.f32.gmra.mxu0 %vm483_vm1, %v2531_v31 }
 0xdb0   : > { %2730 = vmatprep.mubr.msk.f32.mxu0 %vm483_vm1, %v2532_v32  ;;  %v401_v34 = vpop.permute.xlu0 %400 }
 0xdb1   : > { %vm429_vm13 = vcmp.eq.s32.totalorder %v401_v34, %v3352_v17 }
 0xdb2   : > { %v2533_v35 = vsel %vm429_vm13, 1.0, %v3175_v4 }
 0xdb3   : > { %2731 = vmatmul.mubr.msk.f32.gmra.mxu0 %vm483_vm1, %v2533_v35 }
 0xdb4   : > { %2733 = vmatprep.mubr.msk.f32.mxu0 %vm483_vm1, %v2534_v36  ;;  %v407_v37 = vpop.permute.xlu0 %406 }
 0xdb5   : > { %vm431_vm15 = vcmp.eq.s32.totalorder %v407_v37, %v3352_v17 }
 0xdb6   : > { %v2535_v39 = vsel %vm431_vm15, 1.0, %v3175_v4 }
 0xdb7   : > { %2734 = vmatmul.mubr.msk.f32.gmra.mxu0 %vm483_vm1, %v2535_v39 }
 0xdb8   : > { %2736 = vmatprep.mubr.msk.f32.mxu0 %vm483_vm1, %v2536_v40  ;;  %v413_v41 = vpop.permute.xlu0 %412 }
 0xdb9   : > { %vm433_vm3 = vcmp.eq.s32.totalorder %v413_v41, %v3352_v17 }
 0xdba   : > { %v2537_v42 = vsel %vm433_vm3, 1.0, %v3175_v4 }
 0xdbb   : > { %2737 = vmatmul.mubr.msk.f32.gmra.mxu0 %vm483_vm1, %v2537_v42 }
 0xdbc   : > { %2739 = vmatprep.mubr.msk.f32.mxu0 %vm483_vm1, %v2538_v43  ;;  %v419_v44 = vpop.permute.xlu0 %418 }
 0xdbd   : > { %vm435_vm5 = vcmp.eq.s32.totalorder %v419_v44, %v3352_v17 }
 0xdbe   : > { %v2539_v45 = vsel %vm435_vm5, 1.0, %v3175_v4 }
 0xdbf   : > { %2740 = vmatmul.mubr.msk.f32.gmra.mxu0 %vm483_vm1, %v2539_v45  ;;  %vm348_vm1 = vcmask 80896  }
 0xdc0   : > { %2805 = vmatprep.mubr.msk.f32.mxu0 %vm3176_vm0, %v3175_v4 }
 0xe14   : > { %v1204_v46 = vpop.permute.xlu1 %1203 }
 0xe15   : > { %2806 = vmatmul.mubr.msk.f32.vlgmr.msra.gmra.mxu0 %vm698_vm4, %v1204_v46 }
 0xe16   : > { %2820 = vmatpush3.msra.mxu0 %v3290_v5  ;;  %2827 = vmatprep.mubr.msk.f32.mxu0 %vm3176_vm0, %v3175_v4 }
 0xe17   : > { %2821 = vmatprep.subr.mxu0 %v3175_v4 }
 0xe18   : > { %2822 = vmatpush3.msra.mxu0 %v3306_v7 }
 0xe19   : > { %2823 = vmatprep.subr.mxu0 %v3175_v4 }
 0xe1a   : > { %2824 = vmatpush3.msra.mxu0 %v3316_v10 }
 0xe1b   : > { %2825 = vmatprep.subr.mxu0 %v3175_v4 }
 0xe1c   : > { %2826 = vmatpush3.msra.mxu0 %v3327_v13 }
 0xe1d   : > { %2841 = vmatprep.subr.mxu0 %v3175_v4 }
 0xe6f   : > { %v3516_v47 = vpop.f32.mrf.mxu0 }
 0xe70   : > { %v634_v36 = vadd.f32 %v3516_v47, %v3371_v25 }
 0xe71   : > { %v628_v48 = vpop.f32.mrf.mxu0 }
 0xe73   : > { %v3518_v49 = vpop.f32.mrf.mxu0 }
 0xe75   : > { %v3520_v50 = vpop.f32.mrf.mxu0 }
 0xe77   : > { %v3522_v51 = vpop.f32.mrf.mxu0 }
 0xe79   : > { %v3524_v52 = vpop.f32.mrf.mxu0 }
 0xe7b   : > { %v3526_v53 = vpop.f32.mrf.mxu0 }
 0xe7d   : > { %v3528_v55 = vpop.f32.mrf.mxu0 }
 0xe7f   : > { %v3530_v56 = vpop.f32.mrf.mxu0 }
 0xe81   : > { %v3532_v57 = vpop.f32.mrf.mxu0 }
 0xed5   : > { %v1273_v59 = vpop.f32.mrf.mxu0 }
 0xed6   : > { %v1277_v60 = vadd.f32 %v1273_v59, %v624_v58 }
 0xed7   : > { %v2807_v61 = vpop.f32.mrf.mxu0 }
 0xed8   : > { %3015 = vtanh.f32 %v1277_v60  ;;  %v2567_v63 = vmul.f32 -1.442695, %v1277_v60 }
 0xeda   : > { %3017 = vpow2.f32 %v2567_v63  ;;  %v639_v63 = vadd.f32 %v3371_v25, %v3520_v50 }
 0xee5   : > { %v3016_v62 = vpop.eup %3015 }
 0xee6   : > { %1287 = vrot.lane.b32.xlu0 %v3016_v62, %s3177_s25 }
 0xee7   : > { %v3018_v0 = vpop.eup %3017 }
 0xee8   : > { %v1281_v1 = vadd.f32 1.0, %v3018_v0 }
 0xeea   : > { %3019 = vrcp.f32 %v1281_v1 }
 0xef7   : > { %v3020_v2 = vpop.eup %3019 }
 0xef8   : > { %v1285_v8 = vmul.f32 %v3020_v2, %v3463_v15  ;;  %v629_v15 = vadd.f32 %v3371_v25, %v628_v48 }
 0xf58   : > { %v1288_v3 = vpop.permute.xlu0 %1287 }
 0xf59   : > { %v1290_v6 = vmul.f32 %v3020_v2, %v1288_v3 }
 0xf5b   : > { %1292 = vrot.lane.b32.xlu1 %v1290_v6, %s3178_s26 }
 0xfcd   : > { %v1293_v54 = vpop.permute.xlu1 %1292 }
 0xfce   : > { %v1295_v9 = vadd.f32 %v1293_v54, %v1285_v8 }
 0xfd0   : > { %3021 = vtanh.f32 %v1295_v9 }
 0xfdd   : > { %v3022_v11 = vpop.eup %3021 }
 0xfde   : > { %1298 = vrot.lane.b32.xlu0 %v3022_v11, %s3177_s25 }
0x1050   : > { %v1299_v12 = vpop.permute.xlu0 %1298 }
0x1051   : > { %v1301_v14 = vmul.f32 %v3020_v2, %v1299_v12 }
0x1053   : > { %1304 = vrot.lane.b32.xlu1 %v1301_v14, %s3178_s26 }
0x10c5   : > { %v1305_v16 = vpop.permute.xlu1 %1304 }
0x10c6   : > { %2817 = vmatmul.mubr.msk.f32.vlgmr.msra.gmra.mxu1 %vm698_vm4, %v1305_v16 }
0x10c7   : > { %2831 = vmatpush3.msra.mxu1 %v3290_v5  ;;  %2838 = vmatprep.mubr.msk.f32.mxu1 %vm3176_vm0, %v3175_v4 }
0x10c8   : > { %2832 = vmatprep.subr.mxu1 %v3175_v4 }
0x10c9   : > { %2833 = vmatpush3.msra.mxu1 %v3306_v7 }
0x10ca   : > { %2834 = vmatprep.subr.mxu1 %v3175_v4 }
0x10cb   : > { %2835 = vmatpush3.msra.mxu1 %v3316_v10 }
0x10cc   : > { %2836 = vmatprep.subr.mxu1 %v3175_v4 }
0x10cd   : > { %2837 = vmatpush3.msra.mxu1 %v3327_v13 }
0x10ce   : > { %2852 = vmatprep.subr.mxu1 %v3175_v4 }
0x1186   : > { %v1374_v18 = vpop.f32.mrf.mxu1 }
0x1187   : > { %v1378_v19 = vadd.f32 %v1374_v18, %v629_v15 }
0x1188   : > { %v2818_v20 = vpop.f32.mrf.mxu1 }
0x1189   : > { %3023 = vtanh.f32 %v1378_v19  ;;  %v2569_v22 = vmul.f32 -1.442695, %v1378_v19 }
0x118b   : > { %3025 = vpow2.f32 %v2569_v22 }
0x1196   : > { %v3024_v21 = vpop.eup %3023 }
0x1197   : > { %1388 = vrot.lane.b32.xlu0 %v3024_v21, %s3177_s25 }
0x1198   : > { %v3026_v23 = vpop.eup %3025 }
0x1199   : > { %v1382_v24 = vadd.f32 1.0, %v3026_v23 }
0x119b   : > { %3027 = vrcp.f32 %v1382_v24 }
0x11a8   : > { %v3028_v26 = vpop.eup %3027 }
0x11a9   : > { %v1386_v29 = vmul.f32 %v3028_v26, %v1295_v9 }
0x1209   : > { %v1389_v27 = vpop.permute.xlu0 %1388 }
0x120a   : > { %v1391_v28 = vmul.f32 %v3028_v26, %v1389_v27 }
0x120c   : > { %1393 = vrot.lane.b32.xlu1 %v1391_v28, %s3178_s26 }
0x127e   : > { %v1394_v30 = vpop.permute.xlu1 %1393 }
0x127f   : > { %v1396_v31 = vadd.f32 %v1394_v30, %v1386_v29 }
0x1281   : > { %3029 = vtanh.f32 %v1396_v31 }
0x128e   : > { %v3030_v32 = vpop.eup %3029 }
0x128f   : > { %1399 = vrot.lane.b32.xlu0 %v3030_v32, %s3177_s25 }
0x1301   : > { %v1400_v33 = vpop.permute.xlu0 %1399 }
0x1302   : > { %v1402_v34 = vmul.f32 %v3028_v26, %v1400_v33 }
0x1304   : > { %1405 = vrot.lane.b32.xlu1 %v1402_v34, %s3178_s26 }
0x1376   : > { %v1406_v35 = vpop.permute.xlu1 %1405 }
0x1377   : > { %2828 = vmatmul.mubr.msk.f32.vlgmr.msra.gmra.mxu0 %vm698_vm4, %v1406_v35 }
0x1378   : > { %2842 = vmatpush3.msra.mxu0 %v3290_v5  ;;  %2849 = vmatprep.mubr.msk.f32.mxu0 %vm3176_vm0, %v3175_v4 }
0x1379   : > { %2843 = vmatprep.subr.mxu0 %v3175_v4 }
0x137a   : > { %2844 = vmatpush3.msra.mxu0 %v3306_v7 }
0x137b   : > { %2845 = vmatprep.subr.mxu0 %v3175_v4 }
0x137c   : > { %2846 = vmatpush3.msra.mxu0 %v3316_v10 }
0x137d   : > { %2847 = vmatprep.subr.mxu0 %v3175_v4 }
0x137e   : > { %2848 = vmatpush3.msra.mxu0 %v3327_v13 }
0x137f   : > { %2863 = vmatprep.subr.mxu0 %v3175_v4 }
0x1437   : > { %v1475_v37 = vpop.f32.mrf.mxu0 }
0x1438   : > { %v1479_v38 = vadd.f32 %v1475_v37, %v634_v36  ;;  %v3612_v36 = vld [vmem:[%s3794_s4 + $0x18] sm:$0xff]  ;;  %v3621_v37 = vld [vmem:[%s3794_s4 + $0x10] sm:$0xff] }
0x1439   : > { %v2829_v39 = vpop.f32.mrf.mxu0 }
0x143a   : > { %3031 = vtanh.f32 %v1479_v38  ;;  %v2571_v41 = vmul.f32 -1.442695, %v1479_v38  ;;  %v3628_v38 = vld [vmem:[%s3794_s4 + $0x8] sm:$0xff]  ;;  %v649_v39 = vadd.f32 %v3371_v25, %v3524_v52 }
0x143c   : > { %3033 = vpow2.f32 %v2571_v41 }
0x1447   : > { %v3032_v40 = vpop.eup %3031 }
0x1448   : > { %1489 = vrot.lane.b32.xlu0 %v3032_v40, %s3177_s25 }
0x1449   : > { %v3034_v42 = vpop.eup %3033 }
0x144a   : > { %v1483_v43 = vadd.f32 1.0, %v3034_v42 }
0x144c   : > { %3035 = vrcp.f32 %v1483_v43 }
0x1459   : > { %v3036_v44 = vpop.eup %3035 }
0x145a   : > { %v1487_v48 = vmul.f32 %v3036_v44, %v1396_v31 }
0x14ba   : > { %v1490_v45 = vpop.permute.xlu0 %1489 }
0x14bb   : > { %v1492_v46 = vmul.f32 %v3036_v44, %v1490_v45 }
0x14bd   : > { %1494 = vrot.lane.b32.xlu1 %v1492_v46, %s3178_s26 }
0x152f   : > { %v1495_v58 = vpop.permute.xlu1 %1494 }
0x1530   : > { %v1497_v47 = vadd.f32 %v1495_v58, %v1487_v48 }
0x1532   : > { %3037 = vtanh.f32 %v1497_v47 }
0x153f   : > { %v3038_v59 = vpop.eup %3037 }
0x1540   : > { %1500 = vrot.lane.b32.xlu0 %v3038_v59, %s3177_s25 }
0x15b2   : > { %v1501_v60 = vpop.permute.xlu0 %1500 }
0x15b3   : > { %v1503_v61 = vmul.f32 %v3036_v44, %v1501_v60 }
0x15b5   : > { %1506 = vrot.lane.b32.xlu1 %v1503_v61, %s3178_s26 }
0x1627   : > { %v1507_v62 = vpop.permute.xlu1 %1506 }
0x1628   : > { %2839 = vmatmul.mubr.msk.f32.vlgmr.msra.gmra.mxu1 %vm698_vm4, %v1507_v62 }
0x1629   : > { %2853 = vmatpush3.msra.mxu1 %v3290_v5  ;;  %2860 = vmatprep.mubr.msk.f32.mxu1 %vm3176_vm0, %v3175_v4 }
0x162a   : > { %2854 = vmatprep.subr.mxu1 %v3175_v4 }
0x162b   : > { %2855 = vmatpush3.msra.mxu1 %v3306_v7 }
0x162c   : > { %2856 = vmatprep.subr.mxu1 %v3175_v4 }
0x162d   : > { %2857 = vmatpush3.msra.mxu1 %v3316_v10 }
0x162e   : > { %2858 = vmatprep.subr.mxu1 %v3175_v4 }
0x162f   : > { %2859 = vmatpush3.msra.mxu1 %v3327_v13 }
0x1630   : > { %2874 = vmatprep.subr.mxu1 %v3175_v4 }
0x16e8   : > { %v1576_v0 = vpop.f32.mrf.mxu1 }
0x16e9   : > { %v1580_v1 = vadd.f32 %v1576_v0, %v639_v63  ;;  %v3652_v0 = vld [vmem:[%s3794_s4] sm:$0xff] }
0x16ea   : > { %v2840_v2 = vpop.f32.mrf.mxu1 }
0x16eb   : > { %3039 = vtanh.f32 %v1580_v1  ;;  %v2573_v6 = vmul.f32 -1.442695, %v1580_v1  ;;  %v654_v1 = vadd.f32 %v3522_v51, %v3371_v25 }
0x16ed   : > { %3041 = vpow2.f32 %v2573_v6 }
0x16f8   : > { %v3040_v3 = vpop.eup %3039 }
0x16f9   : > { %1590 = vrot.lane.b32.xlu0 %v3040_v3, %s3177_s25 }
0x16fa   : > { %v3042_v8 = vpop.eup %3041 }
0x16fb   : > { %v1584_v54 = vadd.f32 1.0, %v3042_v8 }
0x16fd   : > { %3043 = vrcp.f32 %v1584_v54 }
0x170a   : > { %v3044_v9 = vpop.eup %3043 }
0x170b   : > { %v1588_v14 = vmul.f32 %v3044_v9, %v1497_v47 }
0x176b   : > { %v1591_v11 = vpop.permute.xlu0 %1590 }
0x176c   : > { %v1593_v12 = vmul.f32 %v3044_v9, %v1591_v11 }
0x176e   : > { %1595 = vrot.lane.b32.xlu1 %v1593_v12, %s3178_s26 }
0x17e0   : > { %v1596_v16 = vpop.permute.xlu1 %1595 }
0x17e1   : > { %v1598_v50 = vadd.f32 %v1596_v16, %v1588_v14 }
0x17e3   : > { %3045 = vtanh.f32 %v1598_v50 }
0x17f0   : > { %v3046_v15 = vpop.eup %3045 }
0x17f1   : > { %1601 = vrot.lane.b32.xlu0 %v3046_v15, %s3177_s25 }
0x1863   : > { %v1602_v18 = vpop.permute.xlu0 %1601 }
0x1864   : > { %v1604_v19 = vmul.f32 %v3044_v9, %v1602_v18 }
0x1866   : > { %1607 = vrot.lane.b32.xlu1 %v1604_v19, %s3178_s26 }
0x18d8   : > { %v1608_v20 = vpop.permute.xlu1 %1607 }
0x18d9   : > { %2850 = vmatmul.mubr.msk.f32.vlgmr.msra.gmra.mxu0 %vm698_vm4, %v1608_v20 }
0x18da   : > { %2864 = vmatpush3.msra.mxu0 %v3290_v5  ;;  %2871 = vmatprep.mubr.msk.f32.mxu0 %vm3176_vm0, %v3175_v4  ;;  %v644_v5 = vadd.f32 %v3518_v49, %v3371_v25 }
0x18db   : > { %2865 = vmatprep.subr.mxu0 %v3175_v4 }
0x18dc   : > { %2866 = vmatpush3.msra.mxu0 %v3306_v7 }
0x18dd   : > { %2867 = vmatprep.subr.mxu0 %v3175_v4 }
0x18de   : > { %2868 = vmatpush3.msra.mxu0 %v3316_v10 }
0x18df   : > { %2869 = vmatprep.subr.mxu0 %v3175_v4 }
0x18e0   : > { %2870 = vmatpush3.msra.mxu0 %v3327_v13 }
0x18e1   : > { %2885 = vmatprep.subr.mxu0 %v3175_v4 }
0x1999   : > { %v1677_v21 = vpop.f32.mrf.mxu0 }
0x199a   : > { %v1681_v22 = vadd.f32 %v1677_v21, %v644_v5  ;;  %v3676_v5 = vld [vmem:[%s3795_s5] ss:$0 sm:$0xff] }
0x199b   : > { %v2851_v23 = vpop.f32.mrf.mxu0  ;;  %v659_v21 = vadd.f32 %v3676_v5, %v3528_v55 }
0x199c   : > { %3047 = vtanh.f32 %v1681_v22  ;;  %v2575_v7 = vmul.f32 -1.442695, %v1681_v22 }
0x199e   : > { %3049 = vpow2.f32 %v2575_v7 }
0x19a9   : > { %v3048_v24 = vpop.eup %3047 }
0x19aa   : > { %1691 = vrot.lane.b32.xlu0 %v3048_v24, %s3177_s25 }
0x19ab   : > { %v3050_v26 = vpop.eup %3049 }
0x19ac   : > { %v1685_v10 = vadd.f32 1.0, %v3050_v26 }
0x19ae   : > { %3051 = vrcp.f32 %v1685_v10 }
0x19bb   : > { %v3052_v27 = vpop.eup %3051 }
0x19bc   : > { %v1689_v30 = vmul.f32 %v3052_v27, %v1598_v50 }
0x1a1c   : > { %v1692_v28 = vpop.permute.xlu0 %1691 }
0x1a1d   : > { %v1694_v29 = vmul.f32 %v3052_v27, %v1692_v28 }
0x1a1f   : > { %1696 = vrot.lane.b32.xlu1 %v1694_v29, %s3178_s26 }
0x1a91   : > { %v1697_v31 = vpop.permute.xlu1 %1696 }
0x1a92   : > { %v1699_v49 = vadd.f32 %v1697_v31, %v1689_v30 }
0x1a94   : > { %3053 = vtanh.f32 %v1699_v49 }
0x1aa1   : > { %v3054_v32 = vpop.eup %3053 }
0x1aa2   : > { %1702 = vrot.lane.b32.xlu0 %v3054_v32, %s3177_s25 }
0x1b14   : > { %v1703_v33 = vpop.permute.xlu0 %1702 }
0x1b15   : > { %v1705_v34 = vmul.f32 %v3052_v27, %v1703_v33 }
0x1b17   : > { %1708 = vrot.lane.b32.xlu1 %v1705_v34, %s3178_s26 }
0x1b89   : > { %v1709_v35 = vpop.permute.xlu1 %1708 }
0x1b8a   : > { %2861 = vmatmul.mubr.msk.f32.vlgmr.msra.gmra.mxu1 %vm698_vm4, %v1709_v35 }
0x1b8b   : > { %2875 = vmatpush3.msra.mxu1 %v3612_v36  ;;  %2882 = vmatprep.mubr.msk.f32.mxu1 %vm3176_vm0, %v3175_v4 }
0x1b8c   : > { %2876 = vmatprep.subr.mxu1 %v3175_v4 }
0x1b8d   : > { %2877 = vmatpush3.msra.mxu1 %v3621_v37 }
0x1b8e   : > { %2878 = vmatprep.subr.mxu1 %v3175_v4 }
0x1b8f   : > { %2879 = vmatpush3.msra.mxu1 %v3628_v38 }
0x1b90   : > { %2880 = vmatprep.subr.mxu1 %v3175_v4 }
0x1b91   : > { %2881 = vmatpush3.msra.mxu1 %v3327_v13 }
0x1b92   : > { %2896 = vmatprep.subr.mxu1 %v3175_v4 }
0x1c4a   : > { %v1778_v40 = vpop.f32.mrf.mxu1 }
0x1c4b   : > { %v1782_v41 = vadd.f32 %v1778_v40, %v649_v39  ;;  %v664_v39 = vadd.f32 %v3676_v5, %v3526_v53 }
0x1c4c   : > { %v2862_v42 = vpop.f32.mrf.mxu1 }
0x1c4d   : > { %3055 = vtanh.f32 %v1782_v41  ;;  %v2577_v44 = vmul.f32 -1.442695, %v1782_v41 }
0x1c4f   : > { %3057 = vpow2.f32 %v2577_v44 }
0x1c5a   : > { %v3056_v43 = vpop.eup %3055 }
0x1c5b   : > { %1792 = vrot.lane.b32.xlu0 %v3056_v43, %s3177_s25 }
0x1c5c   : > { %v3058_v45 = vpop.eup %3057 }
0x1c5d   : > { %v1786_v46 = vadd.f32 1.0, %v3058_v45 }
0x1c5f   : > { %3059 = vrcp.f32 %v1786_v46 }
0x1c6c   : > { %v3060_v48 = vpop.eup %3059 }
0x1c6d   : > { %v1790_v47 = vmul.f32 %v3060_v48, %v1699_v49 }
0x1ccd   : > { %v1793_v58 = vpop.permute.xlu0 %1792 }
0x1cce   : > { %v1795_v13 = vmul.f32 %v3060_v48, %v1793_v58 }
0x1cd0   : > { %1797 = vrot.lane.b32.xlu1 %v1795_v13, %s3178_s26 }
0x1d42   : > { %v1798_v59 = vpop.permute.xlu1 %1797 }
0x1d43   : > { %v1800_v52 = vadd.f32 %v1798_v59, %v1790_v47 }
0x1d45   : > { %3061 = vtanh.f32 %v1800_v52 }
0x1d52   : > { %v3062_v60 = vpop.eup %3061 }
0x1d53   : > { %1803 = vrot.lane.b32.xlu0 %v3062_v60, %s3177_s25  ;;  %v669_v60 = vadd.f32 %v3676_v5, %v3532_v57 }
0x1dc5   : > { %v1804_v61 = vpop.permute.xlu0 %1803 }
0x1dc6   : > { %v1806_v62 = vmul.f32 %v3060_v48, %v1804_v61 }
0x1dc8   : > { %1809 = vrot.lane.b32.xlu1 %v1806_v62, %s3178_s26 }
0x1e3a   : > { %v1810_v63 = vpop.permute.xlu1 %1809 }
0x1e3b   : > { %2872 = vmatmul.mubr.msk.f32.vlgmr.msra.gmra.mxu0 %vm698_vm4, %v1810_v63 }
0x1e3c   : > { %2886 = vmatpush3.msra.mxu0 %v3612_v36  ;;  %2893 = vmatprep.mubr.msk.f32.mxu0 %vm3176_vm0, %v3175_v4 }
0x1e3d   : > { %2887 = vmatprep.subr.mxu0 %v3175_v4 }
0x1e3e   : > { %2888 = vmatpush3.msra.mxu0 %v3621_v37 }
0x1e3f   : > { %2889 = vmatprep.subr.mxu0 %v3175_v4 }
0x1e40   : > { %2890 = vmatpush3.msra.mxu0 %v3628_v38 }
0x1e41   : > { %2891 = vmatprep.subr.mxu0 %v3175_v4 }
0x1e42   : > { %2892 = vmatpush3.msra.mxu0 %v3652_v0 }
0x1e43   : > { %2907 = vmatprep.subr.mxu0 %v3175_v4 }
0x1efb   : > { %v1879_v2 = vpop.f32.mrf.mxu0 }
0x1efc   : > { %v1883_v3 = vadd.f32 %v1879_v2, %v654_v1 }
0x1efd   : > { %v2873_v6 = vpop.f32.mrf.mxu0 }
0x1efe   : > { %3063 = vtanh.f32 %v1883_v3  ;;  %v2579_v54 = vmul.f32 -1.442695, %v1883_v3 }
0x1f00   : > { %3065 = vpow2.f32 %v2579_v54 }
0x1f0b   : > { %v3064_v8 = vpop.eup %3063 }
0x1f0c   : > { %1893 = vrot.lane.b32.xlu0 %v3064_v8, %s3177_s25 }
0x1f0d   : > { %v3066_v9 = vpop.eup %3065 }
0x1f0e   : > { %v1887_v11 = vadd.f32 1.0, %v3066_v9 }
0x1f10   : > { %3067 = vrcp.f32 %v1887_v11 }
0x1f1d   : > { %v3068_v12 = vpop.eup %3067 }
0x1f1e   : > { %v1891_v50 = vmul.f32 %v3068_v12, %v1800_v52 }
0x1f7e   : > { %v1894_v14 = vpop.permute.xlu0 %1893 }
0x1f7f   : > { %v1896_v16 = vmul.f32 %v3068_v12, %v1894_v14 }
0x1f81   : > { %1898 = vrot.lane.b32.xlu1 %v1896_v16, %s3178_s26 }
0x1ff3   : > { %v1899_v15 = vpop.permute.xlu1 %1898 }
0x1ff4   : > { %v1901_v25 = vadd.f32 %v1899_v15, %v1891_v50  ;;  %v331_v50 = vld [vmem:[%s326_s13] sm:$0xff]  ;;  %s3118_s13 = scalar_lea.vmem %s3117_s12, 32 }
0x1ff6   : > { %3069 = vtanh.f32 %v1901_v25 }
0x2003   : > { %v3070_v51 = vpop.eup %3069 }
0x2004   : > { %1904 = vrot.lane.b32.xlu0 %v3070_v51, %s3177_s25  ;;  %v2523_v51 = vld [vmem:[%s3793_s3] ss:$0 sm:$0xff] }
0x2076   : > { %v1905_v18 = vpop.permute.xlu0 %1904 }
0x2077   : > { %v1907_v19 = vmul.f32 %v3068_v12, %v1905_v18 }
0x2079   : > { %1910 = vrot.lane.b32.xlu1 %v1907_v19, %s3178_s26 }
0x20eb   : > { %v1911_v20 = vpop.permute.xlu1 %1910 }
0x20ec   : > { %2883 = vmatmul.mubr.msk.f32.vlgmr.msra.gmra.mxu1 %vm698_vm4, %v1911_v20 }
0x20ed   : > { %2897 = vmatpush3.msra.mxu1 %v3612_v36  ;;  %2904 = vmatprep.mubr.msk.f32.mxu1 %vm3176_vm0, %v3175_v4 }
0x20ee   : > { %2898 = vmatprep.subr.mxu1 %v3175_v4 }
0x20ef   : > { %2899 = vmatpush3.msra.mxu1 %v3621_v37 }
0x20f0   : > { %2900 = vmatprep.subr.mxu1 %v3175_v4 }
0x20f1   : > { %2901 = vmatpush3.msra.mxu1 %v3628_v38 }
0x20f2   : > { %2902 = vmatprep.subr.mxu1 %v3175_v4 }
0x20f3   : > { %2903 = vmatpush3.msra.mxu1 %v3652_v0 }
0x20f4   : > { %2918 = vmatprep.subr.mxu1 %v3175_v4 }
0x21ac   : > { %v1980_v22 = vpop.f32.mrf.mxu1 }
0x21ad   : > { %v1984_v23 = vadd.f32 %v1980_v22, %v659_v21 }
0x21ae   : > { %v2884_v24 = vpop.f32.mrf.mxu1 }
0x21af   : > { %3071 = vtanh.f32 %v1984_v23  ;;  %v2581_v26 = vmul.f32 -1.442695, %v1984_v23  ;;  %v674_v24 = vadd.f32 %v3676_v5, %v3530_v56 }
0x21b1   : > { %3073 = vpow2.f32 %v2581_v26 }
0x21bc   : > { %v3072_v7 = vpop.eup %3071 }
0x21bd   : > { %1994 = vrot.lane.b32.xlu0 %v3072_v7, %s3177_s25 }
0x21be   : > { %v3074_v10 = vpop.eup %3073 }
0x21bf   : > { %v1988_v27 = vadd.f32 1.0, %v3074_v10 }
0x21c1   : > { %3075 = vrcp.f32 %v1988_v27 }
0x21ce   : > { %v3076_v28 = vpop.eup %3075 }
0x21cf   : > { %v1992_v31 = vmul.f32 %v3076_v28, %v1901_v25 }
0x222f   : > { %v1995_v29 = vpop.permute.xlu0 %1994 }
0x2230   : > { %v1997_v30 = vmul.f32 %v3076_v28, %v1995_v29 }
0x2232   : > { %1999 = vrot.lane.b32.xlu1 %v1997_v30, %s3178_s26 }
0x22a4   : > { %v2000_v49 = vpop.permute.xlu1 %1999 }
0x22a5   : > { %v2002_v55 = vadd.f32 %v2000_v49, %v1992_v31 }
0x22a7   : > { %3077 = vtanh.f32 %v2002_v55 }
0x22b4   : > { %v3078_v32 = vpop.eup %3077 }
0x22b5   : > { %2005 = vrot.lane.b32.xlu0 %v3078_v32, %s3177_s25 }
0x2327   : > { %v2006_v33 = vpop.permute.xlu0 %2005 }
0x2328   : > { %v2008_v34 = vmul.f32 %v3076_v28, %v2006_v33  ;;  %v2325_v33 = vld [vmem:[%s3796_s6 + $0x18] sm:$0xff] }
0x232a   : > { %2011 = vrot.lane.b32.xlu1 %v2008_v34, %s3178_s26  ;;  %v2324_v34 = vld [vmem:[%s3796_s6 + $0x10] sm:$0xff] }
0x239c   : > { %v2012_v35 = vpop.permute.xlu1 %2011 }
0x239d   : > { %2894 = vmatmul.mubr.msk.f32.vlgmr.msra.gmra.mxu0 %vm698_vm4, %v2012_v35  ;;  %v2323_v35 = vld [vmem:[%s3796_s6 + $0x8] sm:$0xff] }
0x239e   : > { %2908 = vmatpush3.msra.mxu0 %v3612_v36  ;;  %2915 = vmatprep.mubr.msk.f32.mxu0 %vm3176_vm0, %v3175_v4 }
0x239f   : > { %2909 = vmatprep.subr.mxu0 %v3175_v4 }
0x23a0   : > { %2910 = vmatpush3.msra.mxu0 %v3621_v37 }
0x23a1   : > { %2911 = vmatprep.subr.mxu0 %v3175_v4 }
0x23a2   : > { %2912 = vmatpush3.msra.mxu0 %v3628_v38 }
0x23a3   : > { %2913 = vmatprep.subr.mxu0 %v3175_v4 }
0x23a4   : > { %2914 = vmatpush3.msra.mxu0 %v3652_v0 }
0x245d   : > { %v2081_v40 = vpop.f32.mrf.mxu0 }
0x245e   : > { %v2085_v36 = vadd.f32 %v2081_v40, %v664_v39  ;;  %v2322_v39 = vld [vmem:[%s3796_s6] sm:$0xff] }
0x245f   : > { %v2895_v41 = vpop.f32.mrf.mxu0 }
0x2460   : > { %3079 = vtanh.f32 %v2085_v36  ;;  %v2583_v43 = vmul.f32 -1.442695, %v2085_v36 }
0x2462   : > { %3081 = vpow2.f32 %v2583_v43 }
0x246d   : > { %v3080_v42 = vpop.eup %3079 }
0x246e   : > { %2095 = vrot.lane.b32.xlu0 %v3080_v42, %s3177_s25 }
0x246f   : > { %v3082_v37 = vpop.eup %3081 }
0x2470   : > { %v2089_v44 = vadd.f32 1.0, %v3082_v37 }
0x2472   : > { %3083 = vrcp.f32 %v2089_v44 }
0x247f   : > { %v3084_v38 = vpop.eup %3083 }
0x2480   : > { %v2093_v48 = vmul.f32 %v3084_v38, %v2002_v55 }
0x24e0   : > { %v2096_v45 = vpop.permute.xlu0 %2095 }
0x24e1   : > { %v2098_v46 = vmul.f32 %v3084_v38, %v2096_v45 }
0x24e3   : > { %2100 = vrot.lane.b32.xlu1 %v2098_v46, %s3178_s26 }
0x2555   : > { %v2101_v58 = vpop.permute.xlu1 %2100 }
0x2556   : > { %v2103_v53 = vadd.f32 %v2101_v58, %v2093_v48 }
0x2558   : > { %3085 = vtanh.f32 %v2103_v53 }
0x2565   : > { %v3086_v13 = vpop.eup %3085 }
0x2566   : > { %2106 = vrot.lane.b32.xlu0 %v3086_v13, %s3177_s25 }
0x25d8   : > { %v2107_v47 = vpop.permute.xlu0 %2106 }
0x25d9   : > { %v2109_v59 = vmul.f32 %v3084_v38, %v2107_v47 }
0x25db   : > { %2112 = vrot.lane.b32.xlu1 %v2109_v59, %s3178_s26 }
0x264d   : > { %v2113_v52 = vpop.permute.xlu1 %2112 }
0x264e   : > { %2905 = vmatmul.mubr.msk.f32.vlgmr.msra.gmra.mxu1 %vm698_vm4, %v2113_v52 }
0x264f   : > { %2926 = vmatprep.mubr.msk.f32.mxu1 %vm3176_vm0, %v3175_v4  ;;  %2919 = vmatpush3.msra.mxu1 %v2325_v33 }
0x2650   : > { %2920 = vmatprep.subr.mxu1 %v3175_v4 }
0x2651   : > { %2921 = vmatpush3.msra.mxu1 %v2324_v34 }
0x2652   : > { %2922 = vmatprep.subr.mxu1 %v3175_v4 }
0x2653   : > { %2923 = vmatpush3.msra.mxu1 %v2323_v35 }
0x2654   : > { %2924 = vmatprep.subr.mxu1 %v3175_v4 }
0x2655   : > { %2925 = vmatpush3.msra.mxu1 %v2322_v39 }
0x270e   : > { %v2182_v61 = vpop.f32.mrf.mxu1 }
0x270f   : > { %v2186_v62 = vadd.f32 %v2182_v61, %v669_v60 }
0x2710   : > { %v2906_v63 = vpop.f32.mrf.mxu1 }
0x2711   : > { %3087 = vtanh.f32 %v2186_v62  ;;  %v2585_v1 = vmul.f32 -1.442695, %v2186_v62 }
0x2713   : > { %3089 = vpow2.f32 %v2585_v1 }
0x271e   : > { %v3088_v0 = vpop.eup %3087 }
0x271f   : > { %2196 = vrot.lane.b32.xlu0 %v3088_v0, %s3177_s25 }
0x2720   : > { %v3090_v2 = vpop.eup %3089 }
0x2721   : > { %v2190_v3 = vadd.f32 1.0, %v3090_v2 }
0x2723   : > { %3091 = vrcp.f32 %v2190_v3 }
0x2730   : > { %v3092_v6 = vpop.eup %3091 }
0x2731   : > { %v2194_v9 = vmul.f32 %v3092_v6, %v2103_v53 }
0x2791   : > { %v2197_v8 = vpop.permute.xlu0 %2196 }
0x2792   : > { %v2199_v54 = vmul.f32 %v3092_v6, %v2197_v8 }
0x2794   : > { %2201 = vrot.lane.b32.xlu1 %v2199_v54, %s3178_s26 }
0x2806   : > { %v2202_v57 = vpop.permute.xlu1 %2201 }
0x2807   : > { %v2204_v11 = vadd.f32 %v2202_v57, %v2194_v9 }
0x2809   : > { %3093 = vtanh.f32 %v2204_v11 }
0x2816   : > { %v3094_v12 = vpop.eup %3093 }
0x2817   : > { %2207 = vrot.lane.b32.xlu0 %v3094_v12, %s3177_s25 }
0x2889   : > { %v2208_v14 = vpop.permute.xlu0 %2207 }
0x288a   : > { %v2210_v16 = vmul.f32 %v3092_v6, %v2208_v14 }
0x288c   : > { %2213 = vrot.lane.b32.xlu1 %v2210_v16, %s3178_s26 }
0x2890   : > { %335 = vperm.xlu1 %2974, %v331_v50  }
0x28fe   : > { %v2214_v15 = vpop.permute.xlu1 %2213 }
0x28ff   : > { %2916 = vmatmul.mubr.msk.f32.vlgmr.msra.gmra.mxu0 %vm698_vm4, %v2214_v15 }
0x290b   : > { %v336_v25 = vpop.permute.xlu1 %335 }
0x290c   : > { %vm337_vm0 = vcmp.eq.s32.totalorder %v336_v25, %v3352_v17 }
0x290d   : > { %v2522_v18 = vsel %vm337_vm0, 1.0, %v3175_v4 }
0x290e   : > { %v347_v19 = vmul.f32 %v2523_v51, %v2522_v18 }
0x2910   : > { %v349_v20 = vsel %vm348_vm1, %v347_v19, 0.0 }
0x2911   : > { %350 = vadd.xlane.f32.xlu1 %v349_v20 }
0x299a   : > { %v351_v21 = vpop.xlane.xlu1 %350 }
0x299b   : > { %v352_v22 = vmul.f32 1.442695, %v351_v21 }
0x299d   : > { %3095 = vpow2.f32 %v352_v22 }
0x29aa   : > { %v3096_v23 = vpop.eup %3095 }
0x29ab   : > { %355 = vst.msk [vmem:[%s330_s22] sm:$0xff] %vm354_vm6, %v3096_v23  ;;  %s2420_s22 = sshll.u32 %s311_s20, 4  ;;  %s3751_s22 = int_to_ptr.vmem [resolvable:$true] %s2420_s22 }
0x29ac   : > { %s3112_s10 = scalar_lea.vmem %s3751_s22, 16  ;;  %p3119_p0 = scmp.lt.s32.totalorder %s3751_s22, %s3117_s12 }
0x29ad   : > { %p3113_p11 = scmp.ne.s32.totalorder %s3751_s22, %s3112_s10  ;;  %p3120_p1 = scmp.lt.s32.totalorder %s3118_s13, %s3112_s10 }
0x29af   : > { %p3114_p12 = pnand %p3113_p11, %p3263_p5  ;;  %p3121_p2 = por %p3120_p1, %p3119_p0 }
0x29b1   : > { %p3115_p13 = pneg %p3114_p12 }
0x29b3   : > { %p3122_p3 = pnand %p3121_p2, %p3115_p13 }
0x29bf   : > { %v2283_v17 = vpop.f32.mrf.mxu0 }
0x29c0   : > { %v2287_v7 = vadd.f32 %v2283_v17, %v674_v24 }
0x29c1   : > { %v2917_v26 = vpop.f32.mrf.mxu0 }
0x29c2   : > { %3097 = vtanh.f32 %v2287_v7  ;;  %v2587_v27 = vmul.f32 -1.442695, %v2287_v7 }
0x29c4   : > { %3099 = vpow2.f32 %v2587_v27 }
0x29cf   : > { %v3098_v10 = vpop.eup %3097 }
0x29d0   : > { %2297 = vrot.lane.b32.xlu0 %v3098_v10, %s3177_s25 }
0x29d1   : > { %v3100_v28 = vpop.eup %3099 }
0x29d2   : > { %v2291_v29 = vadd.f32 1.0, %v3100_v28 }
0x29d4   : > { %3101 = vrcp.f32 %v2291_v29 }
0x29e1   : > { %v3102_v30 = vpop.eup %3101 }
0x29e2   : > { %v2295_v55 = vmul.f32 %v3102_v30, %v2204_v11 }
0x2a42   : > { %v2298_v31 = vpop.permute.xlu0 %2297 }
0x2a43   : > { %v2300_v49 = vmul.f32 %v3102_v30, %v2298_v31 }
0x2a45   : > { %2302 = vrot.lane.b32.xlu0 %v2300_v49, %s3178_s26 }
0x2ab7   : > { %v2303_v32 = vpop.permute.xlu0 %2302 }
0x2ab8   : > { %v2305_v56 = vadd.f32 %v2303_v32, %v2295_v55 }
0x2aba   : > { %3103 = vtanh.f32 %v2305_v56 }
0x2ac7   : > { %v3104_v5 = vpop.eup %3103 }
0x2ac8   : > { %2308 = vrot.lane.b32.xlu0 %v3104_v5, %s3177_s25 }
0x2b3a   : > { %v2309_v40 = vpop.permute.xlu0 %2308 }
0x2b3b   : > { %v2311_v36 = vmul.f32 %v3102_v30, %v2309_v40 }
0x2b3d   : > { %v2312_v41 = vmul.f32 %v3096_v23, %v2311_v36 }
0x2b3f   : > { %v2314_v42 = vsel %vm2313_vm7, %v2312_v41, 0.0 }
0x2b40   : > { %v2315_v43 = vrot.slane %v2314_v42, 4 }
0x2b42   : > { %v2316_v37 = vadd.f32 %v2315_v43, %v2314_v42 }
0x2b44   : > { %v2317_v44 = vrot.slane %v2316_v37, 2 }
0x2b46   : > { %v2318_v38 = vadd.f32 %v2317_v44, %v2316_v37 }
0x2b48   : > { %v2319_v45 = vrot.slane %v2318_v38, 1 }
0x2b4a   : > { %v2320_v46 = vadd.f32 %v2319_v45, %v2318_v38 }
0x2b4c   : > { %3105 = vtanh.f32 %v2320_v46 }
0x2b59   : > { %v3106_v48 = vpop.eup %3105 }
0x2b5a   : > { %2327 = vrot.lane.b32.xlu0 %v3106_v48, %s3178_s26  ;;  %s2404_s26 = scalar_lea.sflag [#allocation4], %s310_s19 }
0x2bcc   : > { %v2328_v4 = vpop.permute.xlu0 %2327 }
0x2bcd   : > { %2927 = vmatmul.mubr.msk.f32.vlgmr.msra.gmra.mxu1 %vm698_vm4, %v2328_v4 }
0x2c8d   : > { %v2397_v58 = vpop.f32.mrf.mxu1 }
0x2c8e   : > { %2402 = vst.msk [vmem:[%s311_s20] sm:$0x1] %vm2401_vm8, %v2397_v58 }
0x2c8f   : > { %v2928_v53 = vpop.f32.mrf.mxu1 }
0x2c90   : > { %3125 = shalt.err (!%p3122_p3)
}
0x2c91   : > { %s3126_s17 = scalar_lea.hbm %s3749_s18, 16  ;;  %s3130_s21 = scalar_lea.hbm %s3797_s7, 64 }
0x2c92   : > { %p3127_p4 = scmp.ne.s32.totalorder %s3749_s18, %s3126_s17  ;;  %p3131_p9 = scmp.lt.s32.totalorder %s3749_s18, %s3797_s7 }
0x2c93   : > { %p3132_p10 = scmp.lt.s32.totalorder %s3130_s21, %s3126_s17 }
0x2c94   : > { %p3128_p7 = pnand %p3127_p4, %p3263_p5 }
0x2c95   : > { %p3133_p11 = por %p3132_p10, %p3131_p9 }
0x2c96   : > { %p3129_p8 = pneg %p3128_p7 }
0x2c98   : > { %p3134_p12 = pnand %p3133_p11, %p3129_p8 }
0x2c9a   : > { %3137 = shalt.err (!%p3134_p12)
}
0x2c9b   : > { %2929 = dma.vmem_to_hbm [thread:$0]  (%p3263_p5), %s3751_s22, 16, %s3749_s18, %s2404_s26  }
0x2c9c PF: > { %p2935_p13 = scmp.ge.s32.totalorder %s3172_s30, 2  ;;  %s2435_s24 = sand.u32 1, %s3160_s27  }
0x2c9d   : > { %s2436_s10 = scalar_lea.sflag [#allocation4], %s2435_s24 }
0x2c9e   : > { %p2932_p0 = pnand %p2935_p13, %p3267_p6 }
0x2ca0   : > { %p2933_p1 = pneg %p2932_p0 }
0x2ca2   : > { %3155 = dma.done.wait (%p2933_p1), %s2436_s10, 16  }
0x2ca3   : > { %3157 = vsyncadd (%p2933_p1), %s2436_s10, 4294967280  ;;  %p19_p2 = scmp.ge.s32.totalorder %s3250_s11, 6   ;;  %s3801_s27 = smov %s3164_s28 }
0x2ca4   : > { %s3802_s28 = smov %s3168_s29  ;;  %s3803_s29 = smov %s3261_s14 }
0x2ca5   : > { %s3804_s30 = smov %s3250_s11  ;;  %21 = sbr.rel (!%p19_p2) target bundleno = 3 (0x3), region = 98 }
0x2caa   :  { %2447 = vsyncpa [#allocation4], 1 }
0x2cab   :  { %2449 = vsyncpa [#allocation4 + $0x1], 1 }

</bundles_post_ra>
